<compile_context>
chip_gen: v6e
topology: v6e:2x2x1
jax: 0.10.0
libtpu: 0.0.40
codegen_flags: <defaults>
</compile_context>

<pallas_src>
import functools

import jax
import jax.numpy as jnp
from jax import lax
from jax.experimental import pallas as pl
from jax.experimental.pallas import tpu as pltpu

# ---- model hyper-parameters (small, consistent with the module's __init__) ----
VOCAB_DE = 50     # len(DE.vocab)
VOCAB_EN = 64     # len(EN.vocab)
EMB      = 32     # embedding_features
HID      = 32     # hidden_size
LIN      = 32     # linear_size
MEMBERS  = 3      # member_count
PAD_TOKEN = 1
SOS_TOKEN = 2
V_PAD    = 128    # lane-dense padded EN-vocab width for the pred output

# ---- weight-slab row offsets (all 8-aligned; slab width = 128 lanes) ----
W0_OFF,   W0_ROWS   = 0,   EMB        # wih0   (E, 4H)
WHH0_OFF, WHH0_ROWS = 32,  HID        # whh0   (H, 4H)
B0_OFF              = 64              # b0     (1, 4H)   (padded to 8 rows)
W1_OFF,   W1_ROWS   = 72,  2 * HID    # [wih1; whh1] (2H, 4H)
B1_OFF              = 136             # b1     (1, 4H)   (padded to 8 rows)
WLIN_OFF, WLIN_ROWS = 144, HID        # w_lin  (H, LIN)  lane-padded to 128
BLIN_OFF            = 176             # b_lin  (1, LIN)  lane-padded
WOUT_OFF, WOUT_ROWS = 184, LIN        # w_out  (LIN, M)  lane-padded
BOUT_OFF            = 216             # b_out  (1, M)    lane-padded
SLAB_ROWS           = 224


def _vmem():
    return pl.BlockSpec(memory_space=pltpu.MemorySpace.VMEM)


# ---------------- fused Pallas kernel ----------------

def beta_fused_kernel(w_ref,       # (SLAB_ROWS, 128) f32 packed weights
                      emb_ref,     # (T*B, E) f32 embeddings, row n = time*B + batch
                      stack_ref,   # (M+1, N, Vp) f32: planes 0..M-1 member log-probs,
                                   #                   plane M lane 0 = targets (as f32)
                      pred_ref,    # out: (N, Vp) f32
                      loss_ref,    # out: (1, 1) f32
                      *, B, Te):
    H = HID
    Mm = stack_ref.shape[0] - 1
    N, Vp = stack_ref.shape[1], stack_ref.shape[2]
    TB, E = emb_ref.shape
    T = TB // B

    # ---- weights (static, sublane-aligned slices of the slab) ----
    wih0  = w_ref[W0_OFF:W0_OFF + E, :]                   # (E, 4H)
    whh0  = w_ref[WHH0_OFF:WHH0_OFF + H, :]               # (H, 4H)
    b0    = w_ref[B0_OFF:B0_OFF + 1, :]                   # (1, 4H)
    w1cat = w_ref[W1_OFF:W1_OFF + 2 * H, :]               # (2H, 4H) = [wih1; whh1]
    b1    = w_ref[B1_OFF:B1_OFF + 1, :]                   # (1, 4H)

    # ---- batched layer-0 input projection: one MXU push for all T steps ----
    gin0_all = (jnp.dot(emb_ref[...], wih0, preferred_element_type=jnp.float32)
                + b0)                                     # (T*B, 4H)

    def sigmoid(x):
        # exact identity 1/(1+e^-x) == 0.5*(tanh(x/2)+1): EUP tanh, no VPU divide
        return 0.5 * (jnp.tanh(0.5 * x) + 1.0)

    def gates(g):  # g: (B, 4H) lane-dense; static 32-lane slices
        i  = sigmoid(g[:, 0:H])
        f  = sigmoid(g[:, H:2 * H])
        gg = jnp.tanh(g[:, 2 * H:3 * H])
        o  = sigmoid(g[:, 3 * H:4 * H])
        return i, f, gg, o

    # ---- 2-layer unidirectional LSTM, zero init state, batch-major ----
    z = jnp.zeros((B, H), jnp.float32)
    h0, c0, h1, c1 = z, z, z, z
    for t in range(T):                                    # static T -> fully unrolled
        g0 = gin0_all[t * B:(t + 1) * B, :] + jnp.dot(
            h0, whh0, preferred_element_type=jnp.float32)
        i, f, gg, o = gates(g0)
        c0 = f * c0 + i * gg
        h0 = o * jnp.tanh(c0)
        # inter-layer dropout is identity (eval mode); layer-1 fused single matmul
        h01 = jnp.concatenate([h0, h1], axis=1)           # (B, 2H)
        g1 = jnp.dot(h01, w1cat, preferred_element_type=jnp.float32) + b1
        i, f, gg, o = gates(g1)
        c1 = f * c1 + i * gg
        h1 = o * jnp.tanh(c1)

    # ---- alpha head: linear -> output -> softmax over the M members ----
    w_lin = w_ref[WLIN_OFF:WLIN_OFF + H, :]               # (H, 128), lanes >= LIN are 0
    b_lin = w_ref[BLIN_OFF:BLIN_OFF + 1, :]
    w_out = w_ref[WOUT_OFF:WOUT_OFF + LIN, :]             # (LIN, 128), lanes >= M are 0
    b_out = w_ref[BOUT_OFF:BOUT_OFF + 1, :]

    lin = jnp.dot(h1, w_lin, preferred_element_type=jnp.float32) + b_lin        # (B, 128)
    logits = (jnp.dot(lin[:, 0:LIN], w_out, preferred_element_type=jnp.float32)
              + b_out)                                                          # (B, 128)
    mcol = lax.broadcasted_iota(jnp.int32, (B, Vp), 1)
    logits = jnp.where(mcol < Mm, logits, -jnp.inf)       # mask padded member lanes
    lmax = jnp.max(logits, axis=1, keepdims=True)
    e = jnp.exp(logits - lmax)
    alpha = e / jnp.sum(e, axis=1, keepdims=True)         # (B, 128), lanes >= M are 0

    # ---- expand alpha over flattened (b, t) rows: alpha_rows[n, :] = alpha[n // Te, :] ----
    row_n = lax.broadcasted_iota(jnp.int32, (N, Vp), 0)
    alpha_rows = jnp.broadcast_to(alpha[0:1, :], (N, Vp))
    for b in range(1, B):                                 # B small & static
        alpha_rows = jnp.where(row_n >= b * Te,
                               jnp.broadcast_to(alpha[b:b + 1, :], (N, Vp)),
                               alpha_rows)

    # ---- ensemble mixture: pred = log(sum_m exp(logp_m) * alpha_m), max-shifted ----
    mx = stack_ref[0]
    for m in range(1, Mm):
        mx = jnp.maximum(mx, stack_ref[m])                # (N, Vp)
    acc = jnp.zeros((N, Vp), jnp.float32)
    for m in range(Mm):
        acc = acc + jnp.exp(stack_ref[m] - mx) * alpha_rows[:, m:m + 1]
    pred = mx + jnp.log(acc)                              # finite: acc >= alpha_argmax > 0
    pred_ref[...] = pred                                  # lane-dense (N, 128) store

    # ---- masked NLL: gather pred at target, mean over non-pad tokens ----
    y_i = stack_ref[Mm][:, 0:1].astype(jnp.int32)         # (N, 1) targets (exact small ints)
    col = lax.broadcasted_iota(jnp.int32, (N, Vp), 1)
    hit = col == y_i
    reward = jnp.sum(jnp.where(hit, pred, 0.0), axis=1, keepdims=True)   # (N, 1)
    valid = y_i != PAD_TOKEN
    num = jnp.sum(jnp.where(valid, reward, 0.0))
    den = jnp.maximum(jnp.sum(valid.astype(jnp.float32)), 1.0)           # guard all-PAD
    loss_ref[...] = jnp.full((1, 1), -(num / den), dtype=jnp.float32)


# ---------------- one-time parameter packing (outside the per-call jit) ----------------

def pack_beta_params(params):
    """Pack all LSTM / head weights into one (SLAB_ROWS, 128) f32 slab."""
    def piece(a, rows):
        a = jnp.asarray(a, jnp.float32)
        return jnp.pad(a, ((0, rows - a.shape[0]), (0, V_PAD - a.shape[1])))

    slab = jnp.concatenate([
        piece(params["wih0"], W0_ROWS),
        piece(params["whh0"], WHH0_ROWS),
        piece(params["b0"], 8),
        piece(jnp.concatenate([params["wih1"], params["whh1"]], axis=0), W1_ROWS),
        piece(params["b1"], 8),
        piece(params["w_lin"], WLIN_ROWS),
        piece(params["b_lin"], 8),
        piece(params["w_out"], WOUT_ROWS),
        piece(params["b_out"], 8),
    ], axis=0)
    assert slab.shape == (SLAB_ROWS, V_PAD)
    return slab


# ---------------- wrapper (layout plumbing in plain JAX, jitted) ----------------

def _beta_forward(x_de, x_en, emb_table, w_slab, member_logprobs):
    """member_logprobs: (M, B, Te, V_en) == [m.forward(x_de, x_en)[3] for m in members]."""
    B, T_de = x_de.shape
    Te = x_en.shape[1] - 1
    M = member_logprobs.shape[0]
    V = member_logprobs.shape[-1]
    N = B * Te

    # embedding lookup + time-major flatten (dropout = identity in eval mode)
    embeds = emb_table[x_de].astype(jnp.float32)                  # (B, T_de, E)
    emb_all = jnp.transpose(embeds, (1, 0, 2)).reshape(T_de * B, EMB)   # (T*B, E)

    # member log-probs -> (M, N, 128) lane-dense; targets ride along as plane M, lane 0
    stack = member_logprobs.astype(jnp.float32).reshape(M, N, V)
    stack = jnp.pad(stack, ((0, 0), (0, 0), (0, V_PAD - V)))
    y = x_en[:, 1:].reshape(N).astype(jnp.float32)
    y_plane = jnp.zeros((1, N, V_PAD), jnp.float32).at[0, :, 0].set(y)
    stack_packed = jnp.concatenate([stack, y_plane], axis=0)      # (M+1, N, Vp)

    kernel = functools.partial(beta_fused_kernel, B=B, Te=Te)
    pred_pad, loss2d = pl.pallas_call(
        kernel,
        out_shape=(jax.ShapeDtypeStruct((N, V_PAD), jnp.float32),
                   jax.ShapeDtypeStruct((1, 1), jnp.float32)),
        in_specs=[_vmem()] * 3,
        out_specs=(_vmem(), _vmem()),
    )(w_slab, emb_all, stack_packed)

    pred = pred_pad[:, :V].reshape(B, Te, V)
    loss = loss2d[0, 0]
    avg_reward = -loss
    return loss, 0, avg_reward, pred


beta_forward = jax.jit(_beta_forward)


# ---------------- pure-JAX reference (PyTorch-faithful, for the sanity check) ----------------

def reference_forward(x_de, x_en, params, member_logprobs):
    embeds = params["emb"][x_de].astype(jnp.float32)
    B, T, _ = embeds.shape

    def cell(x, h, c, wih, whh, b):
        g = x @ wih + h @ whh + b
        H = h.shape[1]
        i = jax.nn.sigmoid(g[:, :H]); f = jax.nn.sigmoid(g[:, H:2 * H])
        gg = jnp.tanh(g[:, 2 * H:3 * H]); o = jax.nn.sigmoid(g[:, 3 * H:])
        c = f * c + i * gg
        return o * jnp.tanh(c), c

    h0 = c0 = h1 = c1 = jnp.zeros((B, HID), jnp.float32)
    for t in range(T):
        h0, c0 = cell(embeds[:, t, :], h0, c0, params["wih0"], params["whh0"], params["b0"])
        h1, c1 = cell(h0, h1, c1, params["wih1"], params["whh1"], params["b1"])
    lin = h1 @ params["w_lin"] + params["b_lin"]
    logits = lin @ params["w_out"] + params["b_out"]
    alpha = jax.nn.softmax(logits, axis=1)
    stack = jnp.transpose(member_logprobs, (1, 2, 3, 0))          # (B, Te, V, M)
    pred = jnp.log((jnp.exp(stack) * alpha[:, None, None, :]).sum(-1))
    y = x_en[:, 1:]
    reward = jnp.take_along_axis(pred, y[:, :, None], axis=2)[..., 0]
    mask = (y != PAD_TOKEN)
    loss = -(reward * mask).sum() / mask.sum()
    return loss, pred


# ---------------- main ----------------

if __name__ == "__main__":
    key = jax.random.PRNGKey(0)
    ks = jax.random.split(key, 16)

    B, T_DE, SEQ_EN = 2, 8, 9
    TE = SEQ_EN - 1

    params = {
        "emb":   0.1 * jax.random.normal(ks[0], (VOCAB_DE, EMB), jnp.float32),
        "wih0":  0.1 * jax.random.normal(ks[1], (EMB, 4 * HID), jnp.float32),
        "whh0":  0.1 * jax.random.normal(ks[2], (HID, 4 * HID), jnp.float32),
        "b0":    0.1 * jax.random.normal(ks[3], (1, 4 * HID), jnp.float32),
        "wih1":  0.1 * jax.random.normal(ks[4], (HID, 4 * HID), jnp.float32),
        "whh1":  0.1 * jax.random.normal(ks[5], (HID, 4 * HID), jnp.float32),
        "b1":    0.1 * jax.random.normal(ks[6], (1, 4 * HID), jnp.float32),
        "w_lin": 0.1 * jax.random.normal(ks[7], (HID, LIN), jnp.float32),
        "b_lin": 0.1 * jax.random.normal(ks[8], (1, LIN), jnp.float32),
        "w_out": 0.1 * jax.random.normal(ks[9], (LIN, MEMBERS), jnp.float32),
        "b_out": 0.1 * jax.random.normal(ks[10], (1, MEMBERS), jnp.float32),
    }

    # one-time weight packing (hoisted out of the per-call forward)
    w_slab = jax.block_until_ready(pack_beta_params(params))

    x_de = jax.random.randint(ks[11], (B, T_DE), 3, VOCAB_DE, dtype=jnp.int32)
    x_en = jax.random.randint(ks[12], (B, SEQ_EN), 3, VOCAB_EN, dtype=jnp.int32)
    x_en = x_en.at[:, 0].set(SOS_TOKEN)
    x_en = x_en.at[0, -2:].set(PAD_TOKEN)   # exercise the pad mask
    x_en = x_en.at[1, -1:].set(PAD_TOKEN)

    # synthetic member log-probs: log_softmax of random logits over the EN vocab
    member_logits = jax.random.normal(ks[13], (MEMBERS, B, TE, VOCAB_EN), jnp.float32)
    member_logprobs = jax.nn.log_softmax(member_logits, axis=-1)

    loss, zero, avg_reward, pred = beta_forward(x_de, x_en, params["emb"], w_slab,
                                                member_logprobs)
    jax.block_until_ready((loss, pred))

    ref_loss, ref_pred = reference_forward(x_de, x_en, params, member_logprobs)
    assert jnp.allclose(pred, ref_pred, atol=1e-3, rtol=1e-3), "pred mismatch"
    assert jnp.allclose(loss, ref_loss, atol=1e-3, rtol=1e-3), "loss mismatch"
    assert zero == 0

    print("KERNEL_OK")
</pallas_src>

<mosaic_0001>
module attributes {stable_mosaic.version = 11 : i64} {
  func.func @beta_fused_kernel(%arg0: memref<224x128xf32, #tpu.memory_space<vmem>>, %arg1: memref<16x32xf32, #tpu.memory_space<vmem>>, %arg2: memref<4x16x128xf32, #tpu.memory_space<vmem>>, %arg3: memref<16x128xf32, #tpu.memory_space<vmem>>, %arg4: memref<1x1xf32, #tpu.memory_space<vmem>>) attributes {dimension_semantics = [], scalar_prefetch = 0 : i64, scratch_operands = 0 : i64, tpu.core_type = #tpu.core_type<tc>} {
    %c0 = arith.constant 0 : index
    %c0_0 = arith.constant 0 : index
    %0 = vector.load %arg0[%c0, %c0_0] : memref<224x128xf32, #tpu.memory_space<vmem>>, vector<32x128xf32>
    %c32 = arith.constant 32 : index
    %c0_1 = arith.constant 0 : index
    %1 = vector.load %arg0[%c32, %c0_1] : memref<224x128xf32, #tpu.memory_space<vmem>>, vector<32x128xf32>
    %c64 = arith.constant 64 : index
    %c0_2 = arith.constant 0 : index
    %2 = vector.load %arg0[%c64, %c0_2] : memref<224x128xf32, #tpu.memory_space<vmem>>, vector<1x128xf32>
    %c72 = arith.constant 72 : index
    %c0_3 = arith.constant 0 : index
    %3 = vector.load %arg0[%c72, %c0_3] : memref<224x128xf32, #tpu.memory_space<vmem>>, vector<64x128xf32>
    %c136 = arith.constant 136 : index
    %c0_4 = arith.constant 0 : index
    %4 = vector.load %arg0[%c136, %c0_4] : memref<224x128xf32, #tpu.memory_space<vmem>>, vector<1x128xf32>
    %c0_5 = arith.constant 0 : index
    %c0_6 = arith.constant 0 : index
    %5 = vector.load %arg1[%c0_5, %c0_6] : memref<16x32xf32, #tpu.memory_space<vmem>>, vector<16x32xf32>
    %cst = arith.constant dense<0.000000e+00> : vector<16x128xf32>
    %6 = tpu.matmul %5, %0, %cst {dimension_numbers = #tpu.dot_dimension_numbers<[1], [0], [0], [1], [0, 0, 1, 1], [], []>} : vector<16x32xf32>, vector<32x128xf32>, vector<16x128xf32> -> vector<16x128xf32>
    %7 = vector.broadcast %2 : vector<1x128xf32> to vector<16x128xf32>
    %8 = arith.addf %6, %7 : vector<16x128xf32>
    %cst_7 = arith.constant 0.000000e+00 : f32
    %9 = vector.broadcast %cst_7 : f32 to vector<2x32xf32>
    %10 = vector.extract_strided_slice %8 {offsets = [0, 0], sizes = [2, 128], strides = [1, 1]} : vector<16x128xf32> to vector<2x128xf32>
    %cst_8 = arith.constant dense<0.000000e+00> : vector<2x128xf32>
    %11 = tpu.matmul %9, %1, %cst_8 {dimension_numbers = #tpu.dot_dimension_numbers<[1], [0], [0], [1], [0, 0, 1, 1], [], []>} : vector<2x32xf32>, vector<32x128xf32>, vector<2x128xf32> -> vector<2x128xf32>
    %12 = arith.addf %10, %11 : vector<2x128xf32>
    %13 = vector.extract_strided_slice %12 {offsets = [0, 0], sizes = [2, 32], strides = [1, 1]} : vector<2x128xf32> to vector<2x32xf32>
    %cst_9 = arith.constant 5.000000e-01 : f32
    %14 = vector.broadcast %cst_9 : f32 to vector<2x32xf32>
    %15 = arith.mulf %14, %13 : vector<2x32xf32>
    %16 = math.tanh %15 : vector<2x32xf32>
    %cst_10 = arith.constant 1.000000e+00 : f32
    %17 = vector.broadcast %cst_10 : f32 to vector<2x32xf32>
    %18 = arith.addf %16, %17 : vector<2x32xf32>
    %cst_11 = arith.constant 5.000000e-01 : f32
    %19 = vector.broadcast %cst_11 : f32 to vector<2x32xf32>
    %20 = arith.mulf %19, %18 : vector<2x32xf32>
    %21 = vector.extract_strided_slice %12 {offsets = [0, 32], sizes = [2, 32], strides = [1, 1]} : vector<2x128xf32> to vector<2x32xf32>
    %cst_12 = arith.constant 5.000000e-01 : f32
    %22 = vector.broadcast %cst_12 : f32 to vector<2x32xf32>
    %23 = arith.mulf %22, %21 : vector<2x32xf32>
    %24 = math.tanh %23 : vector<2x32xf32>
    %cst_13 = arith.constant 1.000000e+00 : f32
    %25 = vector.broadcast %cst_13 : f32 to vector<2x32xf32>
    %26 = arith.addf %24, %25 : vector<2x32xf32>
    %cst_14 = arith.constant 5.000000e-01 : f32
    %27 = vector.broadcast %cst_14 : f32 to vector<2x32xf32>
    %28 = arith.mulf %27, %26 : vector<2x32xf32>
    %29 = vector.extract_strided_slice %12 {offsets = [0, 64], sizes = [2, 32], strides = [1, 1]} : vector<2x128xf32> to vector<2x32xf32>
    %30 = math.tanh %29 : vector<2x32xf32>
    %31 = vector.extract_strided_slice %12 {offsets = [0, 96], sizes = [2, 32], strides = [1, 1]} : vector<2x128xf32> to vector<2x32xf32>
    %cst_15 = arith.constant 5.000000e-01 : f32
    %32 = vector.broadcast %cst_15 : f32 to vector<2x32xf32>
    %33 = arith.mulf %32, %31 : vector<2x32xf32>
    %34 = math.tanh %33 : vector<2x32xf32>
    %cst_16 = arith.constant 1.000000e+00 : f32
    %35 = vector.broadcast %cst_16 : f32 to vector<2x32xf32>
    %36 = arith.addf %34, %35 : vector<2x32xf32>
    %cst_17 = arith.constant 5.000000e-01 : f32
    %37 = vector.broadcast %cst_17 : f32 to vector<2x32xf32>
    %38 = arith.mulf %37, %36 : vector<2x32xf32>
    %39 = arith.mulf %28, %9 : vector<2x32xf32>
    %40 = arith.mulf %20, %30 : vector<2x32xf32>
    %41 = arith.addf %39, %40 : vector<2x32xf32>
    %42 = math.tanh %41 : vector<2x32xf32>
    %43 = arith.mulf %38, %42 : vector<2x32xf32>
    %44 = tpu.concatenate %43, %9 in 1 : vector<2x32xf32>, vector<2x32xf32> -> vector<2x64xf32>
    %cst_18 = arith.constant dense<0.000000e+00> : vector<2x128xf32>
    %45 = tpu.matmul %44, %3, %cst_18 {dimension_numbers = #tpu.dot_dimension_numbers<[1], [0], [0], [1], [0, 0, 1, 1], [], []>} : vector<2x64xf32>, vector<64x128xf32>, vector<2x128xf32> -> vector<2x128xf32>
    %46 = vector.broadcast %4 : vector<1x128xf32> to vector<2x128xf32>
    %47 = arith.addf %45, %46 : vector<2x128xf32>
    %48 = vector.extract_strided_slice %47 {offsets = [0, 0], sizes = [2, 32], strides = [1, 1]} : vector<2x128xf32> to vector<2x32xf32>
    %cst_19 = arith.constant 5.000000e-01 : f32
    %49 = vector.broadcast %cst_19 : f32 to vector<2x32xf32>
    %50 = arith.mulf %49, %48 : vector<2x32xf32>
    %51 = math.tanh %50 : vector<2x32xf32>
    %cst_20 = arith.constant 1.000000e+00 : f32
    %52 = vector.broadcast %cst_20 : f32 to vector<2x32xf32>
    %53 = arith.addf %51, %52 : vector<2x32xf32>
    %cst_21 = arith.constant 5.000000e-01 : f32
    %54 = vector.broadcast %cst_21 : f32 to vector<2x32xf32>
    %55 = arith.mulf %54, %53 : vector<2x32xf32>
    %56 = vector.extract_strided_slice %47 {offsets = [0, 32], sizes = [2, 32], strides = [1, 1]} : vector<2x128xf32> to vector<2x32xf32>
    %cst_22 = arith.constant 5.000000e-01 : f32
    %57 = vector.broadcast %cst_22 : f32 to vector<2x32xf32>
    %58 = arith.mulf %57, %56 : vector<2x32xf32>
    %59 = math.tanh %58 : vector<2x32xf32>
    %cst_23 = arith.constant 1.000000e+00 : f32
    %60 = vector.broadcast %cst_23 : f32 to vector<2x32xf32>
    %61 = arith.addf %59, %60 : vector<2x32xf32>
    %cst_24 = arith.constant 5.000000e-01 : f32
    %62 = vector.broadcast %cst_24 : f32 to vector<2x32xf32>
    %63 = arith.mulf %62, %61 : vector<2x32xf32>
    %64 = vector.extract_strided_slice %47 {offsets = [0, 64], sizes = [2, 32], strides = [1, 1]} : vector<2x128xf32> to vector<2x32xf32>
    %65 = math.tanh %64 : vector<2x32xf32>
    %66 = vector.extract_strided_slice %47 {offsets = [0, 96], sizes = [2, 32], strides = [1, 1]} : vector<2x128xf32> to vector<2x32xf32>
    %cst_25 = arith.constant 5.000000e-01 : f32
    %67 = vector.broadcast %cst_25 : f32 to vector<2x32xf32>
    %68 = arith.mulf %67, %66 : vector<2x32xf32>
    %69 = math.tanh %68 : vector<2x32xf32>
    %cst_26 = arith.constant 1.000000e+00 : f32
    %70 = vector.broadcast %cst_26 : f32 to vector<2x32xf32>
    %71 = arith.addf %69, %70 : vector<2x32xf32>
    %cst_27 = arith.constant 5.000000e-01 : f32
    %72 = vector.broadcast %cst_27 : f32 to vector<2x32xf32>
    %73 = arith.mulf %72, %71 : vector<2x32xf32>
    %74 = arith.mulf %63, %9 : vector<2x32xf32>
    %75 = arith.mulf %55, %65 : vector<2x32xf32>
    %76 = arith.addf %74, %75 : vector<2x32xf32>
    %77 = math.tanh %76 : vector<2x32xf32>
    %78 = arith.mulf %73, %77 : vector<2x32xf32>
    %79 = vector.extract_strided_slice %8 {offsets = [2, 0], sizes = [2, 128], strides = [1, 1]} : vector<16x128xf32> to vector<2x128xf32>
    %cst_28 = arith.constant dense<0.000000e+00> : vector<2x128xf32>
    %80 = tpu.matmul %43, %1, %cst_28 {dimension_numbers = #tpu.dot_dimension_numbers<[1], [0], [0], [1], [0, 0, 1, 1], [], []>} : vector<2x32xf32>, vector<32x128xf32>, vector<2x128xf32> -> vector<2x128xf32>
    %81 = arith.addf %79, %80 : vector<2x128xf32>
    %82 = vector.extract_strided_slice %81 {offsets = [0, 0], sizes = [2, 32], strides = [1, 1]} : vector<2x128xf32> to vector<2x32xf32>
    %cst_29 = arith.constant 5.000000e-01 : f32
    %83 = vector.broadcast %cst_29 : f32 to vector<2x32xf32>
    %84 = arith.mulf %83, %82 : vector<2x32xf32>
    %85 = math.tanh %84 : vector<2x32xf32>
    %cst_30 = arith.constant 1.000000e+00 : f32
    %86 = vector.broadcast %cst_30 : f32 to vector<2x32xf32>
    %87 = arith.addf %85, %86 : vector<2x32xf32>
    %cst_31 = arith.constant 5.000000e-01 : f32
    %88 = vector.broadcast %cst_31 : f32 to vector<2x32xf32>
    %89 = arith.mulf %88, %87 : vector<2x32xf32>
    %90 = vector.extract_strided_slice %81 {offsets = [0, 32], sizes = [2, 32], strides = [1, 1]} : vector<2x128xf32> to vector<2x32xf32>
    %cst_32 = arith.constant 5.000000e-01 : f32
    %91 = vector.broadcast %cst_32 : f32 to vector<2x32xf32>
    %92 = arith.mulf %91, %90 : vector<2x32xf32>
    %93 = math.tanh %92 : vector<2x32xf32>
    %cst_33 = arith.constant 1.000000e+00 : f32
    %94 = vector.broadcast %cst_33 : f32 to vector<2x32xf32>
    %95 = arith.addf %93, %94 : vector<2x32xf32>
    %cst_34 = arith.constant 5.000000e-01 : f32
    %96 = vector.broadcast %cst_34 : f32 to vector<2x32xf32>
    %97 = arith.mulf %96, %95 : vector<2x32xf32>
    %98 = vector.extract_strided_slice %81 {offsets = [0, 64], sizes = [2, 32], strides = [1, 1]} : vector<2x128xf32> to vector<2x32xf32>
    %99 = math.tanh %98 : vector<2x32xf32>
    %100 = vector.extract_strided_slice %81 {offsets = [0, 96], sizes = [2, 32], strides = [1, 1]} : vector<2x128xf32> to vector<2x32xf32>
    %cst_35 = arith.constant 5.000000e-01 : f32
    %101 = vector.broadcast %cst_35 : f32 to vector<2x32xf32>
    %102 = arith.mulf %101, %100 : vector<2x32xf32>
    %103 = math.tanh %102 : vector<2x32xf32>
    %cst_36 = arith.constant 1.000000e+00 : f32
    %104 = vector.broadcast %cst_36 : f32 to vector<2x32xf32>
    %105 = arith.addf %103, %104 : vector<2x32xf32>
    %cst_37 = arith.constant 5.000000e-01 : f32
    %106 = vector.broadcast %cst_37 : f32 to vector<2x32xf32>
    %107 = arith.mulf %106, %105 : vector<2x32xf32>
    %108 = arith.mulf %97, %41 : vector<2x32xf32>
    %109 = arith.mulf %89, %99 : vector<2x32xf32>
    %110 = arith.addf %108, %109 : vector<2x32xf32>
    %111 = math.tanh %110 : vector<2x32xf32>
    %112 = arith.mulf %107, %111 : vector<2x32xf32>
    %113 = tpu.concatenate %112, %78 in 1 : vector<2x32xf32>, vector<2x32xf32> -> vector<2x64xf32>
    %cst_38 = arith.constant dense<0.000000e+00> : vector<2x128xf32>
    %114 = tpu.matmul %113, %3, %cst_38 {dimension_numbers = #tpu.dot_dimension_numbers<[1], [0], [0], [1], [0, 0, 1, 1], [], []>} : vector<2x64xf32>, vector<64x128xf32>, vector<2x128xf32> -> vector<2x128xf32>
    %115 = vector.broadcast %4 : vector<1x128xf32> to vector<2x128xf32>
    %116 = arith.addf %114, %115 : vector<2x128xf32>
    %117 = vector.extract_strided_slice %116 {offsets = [0, 0], sizes = [2, 32], strides = [1, 1]} : vector<2x128xf32> to vector<2x32xf32>
    %cst_39 = arith.constant 5.000000e-01 : f32
    %118 = vector.broadcast %cst_39 : f32 to vector<2x32xf32>
    %119 = arith.mulf %118, %117 : vector<2x32xf32>
    %120 = math.tanh %119 : vector<2x32xf32>
    %cst_40 = arith.constant 1.000000e+00 : f32
    %121 = vector.broadcast %cst_40 : f32 to vector<2x32xf32>
    %122 = arith.addf %120, %121 : vector<2x32xf32>
    %cst_41 = arith.constant 5.000000e-01 : f32
    %123 = vector.broadcast %cst_41 : f32 to vector<2x32xf32>
    %124 = arith.mulf %123, %122 : vector<2x32xf32>
    %125 = vector.extract_strided_slice %116 {offsets = [0, 32], sizes = [2, 32], strides = [1, 1]} : vector<2x128xf32> to vector<2x32xf32>
    %cst_42 = arith.constant 5.000000e-01 : f32
    %126 = vector.broadcast %cst_42 : f32 to vector<2x32xf32>
    %127 = arith.mulf %126, %125 : vector<2x32xf32>
    %128 = math.tanh %127 : vector<2x32xf32>
    %cst_43 = arith.constant 1.000000e+00 : f32
    %129 = vector.broadcast %cst_43 : f32 to vector<2x32xf32>
    %130 = arith.addf %128, %129 : vector<2x32xf32>
    %cst_44 = arith.constant 5.000000e-01 : f32
    %131 = vector.broadcast %cst_44 : f32 to vector<2x32xf32>
    %132 = arith.mulf %131, %130 : vector<2x32xf32>
    %133 = vector.extract_strided_slice %116 {offsets = [0, 64], sizes = [2, 32], strides = [1, 1]} : vector<2x128xf32> to vector<2x32xf32>
    %134 = math.tanh %133 : vector<2x32xf32>
    %135 = vector.extract_strided_slice %116 {offsets = [0, 96], sizes = [2, 32], strides = [1, 1]} : vector<2x128xf32> to vector<2x32xf32>
    %cst_45 = arith.constant 5.000000e-01 : f32
    %136 = vector.broadcast %cst_45 : f32 to vector<2x32xf32>
    %137 = arith.mulf %136, %135 : vector<2x32xf32>
    %138 = math.tanh %137 : vector<2x32xf32>
    %cst_46 = arith.constant 1.000000e+00 : f32
    %139 = vector.broadcast %cst_46 : f32 to vector<2x32xf32>
    %140 = arith.addf %138, %139 : vector<2x32xf32>
    %cst_47 = arith.constant 5.000000e-01 : f32
    %141 = vector.broadcast %cst_47 : f32 to vector<2x32xf32>
    %142 = arith.mulf %141, %140 : vector<2x32xf32>
    %143 = arith.mulf %132, %76 : vector<2x32xf32>
    %144 = arith.mulf %124, %134 : vector<2x32xf32>
    %145 = arith.addf %143, %144 : vector<2x32xf32>
    %146 = math.tanh %145 : vector<2x32xf32>
    %147 = arith.mulf %142, %146 : vector<2x32xf32>
    %148 = vector.extract_strided_slice %8 {offsets = [4, 0], sizes = [2, 128], strides = [1, 1]} : vector<16x128xf32> to vector<2x128xf32>
    %cst_48 = arith.constant dense<0.000000e+00> : vector<2x128xf32>
    %149 = tpu.matmul %112, %1, %cst_48 {dimension_numbers = #tpu.dot_dimension_numbers<[1], [0], [0], [1], [0, 0, 1, 1], [], []>} : vector<2x32xf32>, vector<32x128xf32>, vector<2x128xf32> -> vector<2x128xf32>
    %150 = arith.addf %148, %149 : vector<2x128xf32>
    %151 = vector.extract_strided_slice %150 {offsets = [0, 0], sizes = [2, 32], strides = [1, 1]} : vector<2x128xf32> to vector<2x32xf32>
    %cst_49 = arith.constant 5.000000e-01 : f32
    %152 = vector.broadcast %cst_49 : f32 to vector<2x32xf32>
    %153 = arith.mulf %152, %151 : vector<2x32xf32>
    %154 = math.tanh %153 : vector<2x32xf32>
    %cst_50 = arith.constant 1.000000e+00 : f32
    %155 = vector.broadcast %cst_50 : f32 to vector<2x32xf32>
    %156 = arith.addf %154, %155 : vector<2x32xf32>
    %cst_51 = arith.constant 5.000000e-01 : f32
    %157 = vector.broadcast %cst_51 : f32 to vector<2x32xf32>
    %158 = arith.mulf %157, %156 : vector<2x32xf32>
    %159 = vector.extract_strided_slice %150 {offsets = [0, 32], sizes = [2, 32], strides = [1, 1]} : vector<2x128xf32> to vector<2x32xf32>
    %cst_52 = arith.constant 5.000000e-01 : f32
    %160 = vector.broadcast %cst_52 : f32 to vector<2x32xf32>
    %161 = arith.mulf %160, %159 : vector<2x32xf32>
    %162 = math.tanh %161 : vector<2x32xf32>
    %cst_53 = arith.constant 1.000000e+00 : f32
    %163 = vector.broadcast %cst_53 : f32 to vector<2x32xf32>
    %164 = arith.addf %162, %163 : vector<2x32xf32>
    %cst_54 = arith.constant 5.000000e-01 : f32
    %165 = vector.broadcast %cst_54 : f32 to vector<2x32xf32>
    %166 = arith.mulf %165, %164 : vector<2x32xf32>
    %167 = vector.extract_strided_slice %150 {offsets = [0, 64], sizes = [2, 32], strides = [1, 1]} : vector<2x128xf32> to vector<2x32xf32>
    %168 = math.tanh %167 : vector<2x32xf32>
    %169 = vector.extract_strided_slice %150 {offsets = [0, 96], sizes = [2, 32], strides = [1, 1]} : vector<2x128xf32> to vector<2x32xf32>
    %cst_55 = arith.constant 5.000000e-01 : f32
    %170 = vector.broadcast %cst_55 : f32 to vector<2x32xf32>
    %171 = arith.mulf %170, %169 : vector<2x32xf32>
    %172 = math.tanh %171 : vector<2x32xf32>
    %cst_56 = arith.constant 1.000000e+00 : f32
    %173 = vector.broadcast %cst_56 : f32 to vector<2x32xf32>
    %174 = arith.addf %172, %173 : vector<2x32xf32>
    %cst_57 = arith.constant 5.000000e-01 : f32
    %175 = vector.broadcast %cst_57 : f32 to vector<2x32xf32>
    %176 = arith.mulf %175, %174 : vector<2x32xf32>
    %177 = arith.mulf %166, %110 : vector<2x32xf32>
    %178 = arith.mulf %158, %168 : vector<2x32xf32>
    %179 = arith.addf %177, %178 : vector<2x32xf32>
    %180 = math.tanh %179 : vector<2x32xf32>
    %181 = arith.mulf %176, %180 : vector<2x32xf32>
    %182 = tpu.concatenate %181, %147 in 1 : vector<2x32xf32>, vector<2x32xf32> -> vector<2x64xf32>
    %cst_58 = arith.constant dense<0.000000e+00> : vector<2x128xf32>
    %183 = tpu.matmul %182, %3, %cst_58 {dimension_numbers = #tpu.dot_dimension_numbers<[1], [0], [0], [1], [0, 0, 1, 1], [], []>} : vector<2x64xf32>, vector<64x128xf32>, vector<2x128xf32> -> vector<2x128xf32>
    %184 = vector.broadcast %4 : vector<1x128xf32> to vector<2x128xf32>
    %185 = arith.addf %183, %184 : vector<2x128xf32>
    %186 = vector.extract_strided_slice %185 {offsets = [0, 0], sizes = [2, 32], strides = [1, 1]} : vector<2x128xf32> to vector<2x32xf32>
    %cst_59 = arith.constant 5.000000e-01 : f32
    %187 = vector.broadcast %cst_59 : f32 to vector<2x32xf32>
    %188 = arith.mulf %187, %186 : vector<2x32xf32>
    %189 = math.tanh %188 : vector<2x32xf32>
    %cst_60 = arith.constant 1.000000e+00 : f32
    %190 = vector.broadcast %cst_60 : f32 to vector<2x32xf32>
    %191 = arith.addf %189, %190 : vector<2x32xf32>
    %cst_61 = arith.constant 5.000000e-01 : f32
    %192 = vector.broadcast %cst_61 : f32 to vector<2x32xf32>
    %193 = arith.mulf %192, %191 : vector<2x32xf32>
    %194 = vector.extract_strided_slice %185 {offsets = [0, 32], sizes = [2, 32], strides = [1, 1]} : vector<2x128xf32> to vector<2x32xf32>
    %cst_62 = arith.constant 5.000000e-01 : f32
    %195 = vector.broadcast %cst_62 : f32 to vector<2x32xf32>
    %196 = arith.mulf %195, %194 : vector<2x32xf32>
    %197 = math.tanh %196 : vector<2x32xf32>
    %cst_63 = arith.constant 1.000000e+00 : f32
    %198 = vector.broadcast %cst_63 : f32 to vector<2x32xf32>
    %199 = arith.addf %197, %198 : vector<2x32xf32>
    %cst_64 = arith.constant 5.000000e-01 : f32
    %200 = vector.broadcast %cst_64 : f32 to vector<2x32xf32>
    %201 = arith.mulf %200, %199 : vector<2x32xf32>
    %202 = vector.extract_strided_slice %185 {offsets = [0, 64], sizes = [2, 32], strides = [1, 1]} : vector<2x128xf32> to vector<2x32xf32>
    %203 = math.tanh %202 : vector<2x32xf32>
    %204 = vector.extract_strided_slice %185 {offsets = [0, 96], sizes = [2, 32], strides = [1, 1]} : vector<2x128xf32> to vector<2x32xf32>
    %cst_65 = arith.constant 5.000000e-01 : f32
    %205 = vector.broadcast %cst_65 : f32 to vector<2x32xf32>
    %206 = arith.mulf %205, %204 : vector<2x32xf32>
    %207 = math.tanh %206 : vector<2x32xf32>
    %cst_66 = arith.constant 1.000000e+00 : f32
    %208 = vector.broadcast %cst_66 : f32 to vector<2x32xf32>
    %209 = arith.addf %207, %208 : vector<2x32xf32>
    %cst_67 = arith.constant 5.000000e-01 : f32
    %210 = vector.broadcast %cst_67 : f32 to vector<2x32xf32>
    %211 = arith.mulf %210, %209 : vector<2x32xf32>
    %212 = arith.mulf %201, %145 : vector<2x32xf32>
    %213 = arith.mulf %193, %203 : vector<2x32xf32>
    %214 = arith.addf %212, %213 : vector<2x32xf32>
    %215 = math.tanh %214 : vector<2x32xf32>
    %216 = arith.mulf %211, %215 : vector<2x32xf32>
    %217 = vector.extract_strided_slice %8 {offsets = [6, 0], sizes = [2, 128], strides = [1, 1]} : vector<16x128xf32> to vector<2x128xf32>
    %cst_68 = arith.constant dense<0.000000e+00> : vector<2x128xf32>
    %218 = tpu.matmul %181, %1, %cst_68 {dimension_numbers = #tpu.dot_dimension_numbers<[1], [0], [0], [1], [0, 0, 1, 1], [], []>} : vector<2x32xf32>, vector<32x128xf32>, vector<2x128xf32> -> vector<2x128xf32>
    %219 = arith.addf %217, %218 : vector<2x128xf32>
    %220 = vector.extract_strided_slice %219 {offsets = [0, 0], sizes = [2, 32], strides = [1, 1]} : vector<2x128xf32> to vector<2x32xf32>
    %cst_69 = arith.constant 5.000000e-01 : f32
    %221 = vector.broadcast %cst_69 : f32 to vector<2x32xf32>
    %222 = arith.mulf %221, %220 : vector<2x32xf32>
    %223 = math.tanh %222 : vector<2x32xf32>
    %cst_70 = arith.constant 1.000000e+00 : f32
    %224 = vector.broadcast %cst_70 : f32 to vector<2x32xf32>
    %225 = arith.addf %223, %224 : vector<2x32xf32>
    %cst_71 = arith.constant 5.000000e-01 : f32
    %226 = vector.broadcast %cst_71 : f32 to vector<2x32xf32>
    %227 = arith.mulf %226, %225 : vector<2x32xf32>
    %228 = vector.extract_strided_slice %219 {offsets = [0, 32], sizes = [2, 32], strides = [1, 1]} : vector<2x128xf32> to vector<2x32xf32>
    %cst_72 = arith.constant 5.000000e-01 : f32
    %229 = vector.broadcast %cst_72 : f32 to vector<2x32xf32>
    %230 = arith.mulf %229, %228 : vector<2x32xf32>
    %231 = math.tanh %230 : vector<2x32xf32>
    %cst_73 = arith.constant 1.000000e+00 : f32
    %232 = vector.broadcast %cst_73 : f32 to vector<2x32xf32>
    %233 = arith.addf %231, %232 : vector<2x32xf32>
    %cst_74 = arith.constant 5.000000e-01 : f32
    %234 = vector.broadcast %cst_74 : f32 to vector<2x32xf32>
    %235 = arith.mulf %234, %233 : vector<2x32xf32>
    %236 = vector.extract_strided_slice %219 {offsets = [0, 64], sizes = [2, 32], strides = [1, 1]} : vector<2x128xf32> to vector<2x32xf32>
    %237 = math.tanh %236 : vector<2x32xf32>
    %238 = vector.extract_strided_slice %219 {offsets = [0, 96], sizes = [2, 32], strides = [1, 1]} : vector<2x128xf32> to vector<2x32xf32>
    %cst_75 = arith.constant 5.000000e-01 : f32
    %239 = vector.broadcast %cst_75 : f32 to vector<2x32xf32>
    %240 = arith.mulf %239, %238 : vector<2x32xf32>
    %241 = math.tanh %240 : vector<2x32xf32>
    %cst_76 = arith.constant 1.000000e+00 : f32
    %242 = vector.broadcast %cst_76 : f32 to vector<2x32xf32>
    %243 = arith.addf %241, %242 : vector<2x32xf32>
    %cst_77 = arith.constant 5.000000e-01 : f32
    %244 = vector.broadcast %cst_77 : f32 to vector<2x32xf32>
    %245 = arith.mulf %244, %243 : vector<2x32xf32>
    %246 = arith.mulf %235, %179 : vector<2x32xf32>
    %247 = arith.mulf %227, %237 : vector<2x32xf32>
    %248 = arith.addf %246, %247 : vector<2x32xf32>
    %249 = math.tanh %248 : vector<2x32xf32>
    %250 = arith.mulf %245, %249 : vector<2x32xf32>
    %251 = tpu.concatenate %250, %216 in 1 : vector<2x32xf32>, vector<2x32xf32> -> vector<2x64xf32>
    %cst_78 = arith.constant dense<0.000000e+00> : vector<2x128xf32>
    %252 = tpu.matmul %251, %3, %cst_78 {dimension_numbers = #tpu.dot_dimension_numbers<[1], [0], [0], [1], [0, 0, 1, 1], [], []>} : vector<2x64xf32>, vector<64x128xf32>, vector<2x128xf32> -> vector<2x128xf32>
    %253 = vector.broadcast %4 : vector<1x128xf32> to vector<2x128xf32>
    %254 = arith.addf %252, %253 : vector<2x128xf32>
    %255 = vector.extract_strided_slice %254 {offsets = [0, 0], sizes = [2, 32], strides = [1, 1]} : vector<2x128xf32> to vector<2x32xf32>
    %cst_79 = arith.constant 5.000000e-01 : f32
    %256 = vector.broadcast %cst_79 : f32 to vector<2x32xf32>
    %257 = arith.mulf %256, %255 : vector<2x32xf32>
    %258 = math.tanh %257 : vector<2x32xf32>
    %cst_80 = arith.constant 1.000000e+00 : f32
    %259 = vector.broadcast %cst_80 : f32 to vector<2x32xf32>
    %260 = arith.addf %258, %259 : vector<2x32xf32>
    %cst_81 = arith.constant 5.000000e-01 : f32
    %261 = vector.broadcast %cst_81 : f32 to vector<2x32xf32>
    %262 = arith.mulf %261, %260 : vector<2x32xf32>
    %263 = vector.extract_strided_slice %254 {offsets = [0, 32], sizes = [2, 32], strides = [1, 1]} : vector<2x128xf32> to vector<2x32xf32>
    %cst_82 = arith.constant 5.000000e-01 : f32
    %264 = vector.broadcast %cst_82 : f32 to vector<2x32xf32>
    %265 = arith.mulf %264, %263 : vector<2x32xf32>
    %266 = math.tanh %265 : vector<2x32xf32>
    %cst_83 = arith.constant 1.000000e+00 : f32
    %267 = vector.broadcast %cst_83 : f32 to vector<2x32xf32>
    %268 = arith.addf %266, %267 : vector<2x32xf32>
    %cst_84 = arith.constant 5.000000e-01 : f32
    %269 = vector.broadcast %cst_84 : f32 to vector<2x32xf32>
    %270 = arith.mulf %269, %268 : vector<2x32xf32>
    %271 = vector.extract_strided_slice %254 {offsets = [0, 64], sizes = [2, 32], strides = [1, 1]} : vector<2x128xf32> to vector<2x32xf32>
    %272 = math.tanh %271 : vector<2x32xf32>
    %273 = vector.extract_strided_slice %254 {offsets = [0, 96], sizes = [2, 32], strides = [1, 1]} : vector<2x128xf32> to vector<2x32xf32>
    %cst_85 = arith.constant 5.000000e-01 : f32
    %274 = vector.broadcast %cst_85 : f32 to vector<2x32xf32>
    %275 = arith.mulf %274, %273 : vector<2x32xf32>
    %276 = math.tanh %275 : vector<2x32xf32>
    %cst_86 = arith.constant 1.000000e+00 : f32
    %277 = vector.broadcast %cst_86 : f32 to vector<2x32xf32>
    %278 = arith.addf %276, %277 : vector<2x32xf32>
    %cst_87 = arith.constant 5.000000e-01 : f32
    %279 = vector.broadcast %cst_87 : f32 to vector<2x32xf32>
    %280 = arith.mulf %279, %278 : vector<2x32xf32>
    %281 = arith.mulf %270, %214 : vector<2x32xf32>
    %282 = arith.mulf %262, %272 : vector<2x32xf32>
    %283 = arith.addf %281, %282 : vector<2x32xf32>
    %284 = math.tanh %283 : vector<2x32xf32>
    %285 = arith.mulf %280, %284 : vector<2x32xf32>
    %286 = vector.extract_strided_slice %8 {offsets = [8, 0], sizes = [2, 128], strides = [1, 1]} : vector<16x128xf32> to vector<2x128xf32>
    %cst_88 = arith.constant dense<0.000000e+00> : vector<2x128xf32>
    %287 = tpu.matmul %250, %1, %cst_88 {dimension_numbers = #tpu.dot_dimension_numbers<[1], [0], [0], [1], [0, 0, 1, 1], [], []>} : vector<2x32xf32>, vector<32x128xf32>, vector<2x128xf32> -> vector<2x128xf32>
    %288 = arith.addf %286, %287 : vector<2x128xf32>
    %289 = vector.extract_strided_slice %288 {offsets = [0, 0], sizes = [2, 32], strides = [1, 1]} : vector<2x128xf32> to vector<2x32xf32>
    %cst_89 = arith.constant 5.000000e-01 : f32
    %290 = vector.broadcast %cst_89 : f32 to vector<2x32xf32>
    %291 = arith.mulf %290, %289 : vector<2x32xf32>
    %292 = math.tanh %291 : vector<2x32xf32>
    %cst_90 = arith.constant 1.000000e+00 : f32
    %293 = vector.broadcast %cst_90 : f32 to vector<2x32xf32>
    %294 = arith.addf %292, %293 : vector<2x32xf32>
    %cst_91 = arith.constant 5.000000e-01 : f32
    %295 = vector.broadcast %cst_91 : f32 to vector<2x32xf32>
    %296 = arith.mulf %295, %294 : vector<2x32xf32>
    %297 = vector.extract_strided_slice %288 {offsets = [0, 32], sizes = [2, 32], strides = [1, 1]} : vector<2x128xf32> to vector<2x32xf32>
    %cst_92 = arith.constant 5.000000e-01 : f32
    %298 = vector.broadcast %cst_92 : f32 to vector<2x32xf32>
    %299 = arith.mulf %298, %297 : vector<2x32xf32>
    %300 = math.tanh %299 : vector<2x32xf32>
    %cst_93 = arith.constant 1.000000e+00 : f32
    %301 = vector.broadcast %cst_93 : f32 to vector<2x32xf32>
    %302 = arith.addf %300, %301 : vector<2x32xf32>
    %cst_94 = arith.constant 5.000000e-01 : f32
    %303 = vector.broadcast %cst_94 : f32 to vector<2x32xf32>
    %304 = arith.mulf %303, %302 : vector<2x32xf32>
    %305 = vector.extract_strided_slice %288 {offsets = [0, 64], sizes = [2, 32], strides = [1, 1]} : vector<2x128xf32> to vector<2x32xf32>
    %306 = math.tanh %305 : vector<2x32xf32>
    %307 = vector.extract_strided_slice %288 {offsets = [0, 96], sizes = [2, 32], strides = [1, 1]} : vector<2x128xf32> to vector<2x32xf32>
    %cst_95 = arith.constant 5.000000e-01 : f32
    %308 = vector.broadcast %cst_95 : f32 to vector<2x32xf32>
    %309 = arith.mulf %308, %307 : vector<2x32xf32>
    %310 = math.tanh %309 : vector<2x32xf32>
    %cst_96 = arith.constant 1.000000e+00 : f32
    %311 = vector.broadcast %cst_96 : f32 to vector<2x32xf32>
    %312 = arith.addf %310, %311 : vector<2x32xf32>
    %cst_97 = arith.constant 5.000000e-01 : f32
    %313 = vector.broadcast %cst_97 : f32 to vector<2x32xf32>
    %314 = arith.mulf %313, %312 : vector<2x32xf32>
    %315 = arith.mulf %304, %248 : vector<2x32xf32>
    %316 = arith.mulf %296, %306 : vector<2x32xf32>
    %317 = arith.addf %315, %316 : vector<2x32xf32>
    %318 = math.tanh %317 : vector<2x32xf32>
    %319 = arith.mulf %314, %318 : vector<2x32xf32>
    %320 = tpu.concatenate %319, %285 in 1 : vector<2x32xf32>, vector<2x32xf32> -> vector<2x64xf32>
    %cst_98 = arith.constant dense<0.000000e+00> : vector<2x128xf32>
    %321 = tpu.matmul %320, %3, %cst_98 {dimension_numbers = #tpu.dot_dimension_numbers<[1], [0], [0], [1], [0, 0, 1, 1], [], []>} : vector<2x64xf32>, vector<64x128xf32>, vector<2x128xf32> -> vector<2x128xf32>
    %322 = vector.broadcast %4 : vector<1x128xf32> to vector<2x128xf32>
    %323 = arith.addf %321, %322 : vector<2x128xf32>
    %324 = vector.extract_strided_slice %323 {offsets = [0, 0], sizes = [2, 32], strides = [1, 1]} : vector<2x128xf32> to vector<2x32xf32>
    %cst_99 = arith.constant 5.000000e-01 : f32
    %325 = vector.broadcast %cst_99 : f32 to vector<2x32xf32>
    %326 = arith.mulf %325, %324 : vector<2x32xf32>
    %327 = math.tanh %326 : vector<2x32xf32>
    %cst_100 = arith.constant 1.000000e+00 : f32
    %328 = vector.broadcast %cst_100 : f32 to vector<2x32xf32>
    %329 = arith.addf %327, %328 : vector<2x32xf32>
    %cst_101 = arith.constant 5.000000e-01 : f32
    %330 = vector.broadcast %cst_101 : f32 to vector<2x32xf32>
    %331 = arith.mulf %330, %329 : vector<2x32xf32>
    %332 = vector.extract_strided_slice %323 {offsets = [0, 32], sizes = [2, 32], strides = [1, 1]} : vector<2x128xf32> to vector<2x32xf32>
    %cst_102 = arith.constant 5.000000e-01 : f32
    %333 = vector.broadcast %cst_102 : f32 to vector<2x32xf32>
    %334 = arith.mulf %333, %332 : vector<2x32xf32>
    %335 = math.tanh %334 : vector<2x32xf32>
    %cst_103 = arith.constant 1.000000e+00 : f32
    %336 = vector.broadcast %cst_103 : f32 to vector<2x32xf32>
    %337 = arith.addf %335, %336 : vector<2x32xf32>
    %cst_104 = arith.constant 5.000000e-01 : f32
    %338 = vector.broadcast %cst_104 : f32 to vector<2x32xf32>
    %339 = arith.mulf %338, %337 : vector<2x32xf32>
    %340 = vector.extract_strided_slice %323 {offsets = [0, 64], sizes = [2, 32], strides = [1, 1]} : vector<2x128xf32> to vector<2x32xf32>
    %341 = math.tanh %340 : vector<2x32xf32>
    %342 = vector.extract_strided_slice %323 {offsets = [0, 96], sizes = [2, 32], strides = [1, 1]} : vector<2x128xf32> to vector<2x32xf32>
    %cst_105 = arith.constant 5.000000e-01 : f32
    %343 = vector.broadcast %cst_105 : f32 to vector<2x32xf32>
    %344 = arith.mulf %343, %342 : vector<2x32xf32>
    %345 = math.tanh %344 : vector<2x32xf32>
    %cst_106 = arith.constant 1.000000e+00 : f32
    %346 = vector.broadcast %cst_106 : f32 to vector<2x32xf32>
    %347 = arith.addf %345, %346 : vector<2x32xf32>
    %cst_107 = arith.constant 5.000000e-01 : f32
    %348 = vector.broadcast %cst_107 : f32 to vector<2x32xf32>
    %349 = arith.mulf %348, %347 : vector<2x32xf32>
    %350 = arith.mulf %339, %283 : vector<2x32xf32>
    %351 = arith.mulf %331, %341 : vector<2x32xf32>
    %352 = arith.addf %350, %351 : vector<2x32xf32>
    %353 = math.tanh %352 : vector<2x32xf32>
    %354 = arith.mulf %349, %353 : vector<2x32xf32>
    %355 = vector.extract_strided_slice %8 {offsets = [10, 0], sizes = [2, 128], strides = [1, 1]} : vector<16x128xf32> to vector<2x128xf32>
    %cst_108 = arith.constant dense<0.000000e+00> : vector<2x128xf32>
    %356 = tpu.matmul %319, %1, %cst_108 {dimension_numbers = #tpu.dot_dimension_numbers<[1], [0], [0], [1], [0, 0, 1, 1], [], []>} : vector<2x32xf32>, vector<32x128xf32>, vector<2x128xf32> -> vector<2x128xf32>
    %357 = arith.addf %355, %356 : vector<2x128xf32>
    %358 = vector.extract_strided_slice %357 {offsets = [0, 0], sizes = [2, 32], strides = [1, 1]} : vector<2x128xf32> to vector<2x32xf32>
    %cst_109 = arith.constant 5.000000e-01 : f32
    %359 = vector.broadcast %cst_109 : f32 to vector<2x32xf32>
    %360 = arith.mulf %359, %358 : vector<2x32xf32>
    %361 = math.tanh %360 : vector<2x32xf32>
    %cst_110 = arith.constant 1.000000e+00 : f32
    %362 = vector.broadcast %cst_110 : f32 to vector<2x32xf32>
    %363 = arith.addf %361, %362 : vector<2x32xf32>
    %cst_111 = arith.constant 5.000000e-01 : f32
    %364 = vector.broadcast %cst_111 : f32 to vector<2x32xf32>
    %365 = arith.mulf %364, %363 : vector<2x32xf32>
    %366 = vector.extract_strided_slice %357 {offsets = [0, 32], sizes = [2, 32], strides = [1, 1]} : vector<2x128xf32> to vector<2x32xf32>
    %cst_112 = arith.constant 5.000000e-01 : f32
    %367 = vector.broadcast %cst_112 : f32 to vector<2x32xf32>
    %368 = arith.mulf %367, %366 : vector<2x32xf32>
    %369 = math.tanh %368 : vector<2x32xf32>
    %cst_113 = arith.constant 1.000000e+00 : f32
    %370 = vector.broadcast %cst_113 : f32 to vector<2x32xf32>
    %371 = arith.addf %369, %370 : vector<2x32xf32>
    %cst_114 = arith.constant 5.000000e-01 : f32
    %372 = vector.broadcast %cst_114 : f32 to vector<2x32xf32>
    %373 = arith.mulf %372, %371 : vector<2x32xf32>
    %374 = vector.extract_strided_slice %357 {offsets = [0, 64], sizes = [2, 32], strides = [1, 1]} : vector<2x128xf32> to vector<2x32xf32>
    %375 = math.tanh %374 : vector<2x32xf32>
    %376 = vector.extract_strided_slice %357 {offsets = [0, 96], sizes = [2, 32], strides = [1, 1]} : vector<2x128xf32> to vector<2x32xf32>
    %cst_115 = arith.constant 5.000000e-01 : f32
    %377 = vector.broadcast %cst_115 : f32 to vector<2x32xf32>
    %378 = arith.mulf %377, %376 : vector<2x32xf32>
    %379 = math.tanh %378 : vector<2x32xf32>
    %cst_116 = arith.constant 1.000000e+00 : f32
    %380 = vector.broadcast %cst_116 : f32 to vector<2x32xf32>
    %381 = arith.addf %379, %380 : vector<2x32xf32>
    %cst_117 = arith.constant 5.000000e-01 : f32
    %382 = vector.broadcast %cst_117 : f32 to vector<2x32xf32>
    %383 = arith.mulf %382, %381 : vector<2x32xf32>
    %384 = arith.mulf %373, %317 : vector<2x32xf32>
    %385 = arith.mulf %365, %375 : vector<2x32xf32>
    %386 = arith.addf %384, %385 : vector<2x32xf32>
    %387 = math.tanh %386 : vector<2x32xf32>
    %388 = arith.mulf %383, %387 : vector<2x32xf32>
    %389 = tpu.concatenate %388, %354 in 1 : vector<2x32xf32>, vector<2x32xf32> -> vector<2x64xf32>
    %cst_118 = arith.constant dense<0.000000e+00> : vector<2x128xf32>
    %390 = tpu.matmul %389, %3, %cst_118 {dimension_numbers = #tpu.dot_dimension_numbers<[1], [0], [0], [1], [0, 0, 1, 1], [], []>} : vector<2x64xf32>, vector<64x128xf32>, vector<2x128xf32> -> vector<2x128xf32>
    %391 = vector.broadcast %4 : vector<1x128xf32> to vector<2x128xf32>
    %392 = arith.addf %390, %391 : vector<2x128xf32>
    %393 = vector.extract_strided_slice %392 {offsets = [0, 0], sizes = [2, 32], strides = [1, 1]} : vector<2x128xf32> to vector<2x32xf32>
    %cst_119 = arith.constant 5.000000e-01 : f32
    %394 = vector.broadcast %cst_119 : f32 to vector<2x32xf32>
    %395 = arith.mulf %394, %393 : vector<2x32xf32>
    %396 = math.tanh %395 : vector<2x32xf32>
    %cst_120 = arith.constant 1.000000e+00 : f32
    %397 = vector.broadcast %cst_120 : f32 to vector<2x32xf32>
    %398 = arith.addf %396, %397 : vector<2x32xf32>
    %cst_121 = arith.constant 5.000000e-01 : f32
    %399 = vector.broadcast %cst_121 : f32 to vector<2x32xf32>
    %400 = arith.mulf %399, %398 : vector<2x32xf32>
    %401 = vector.extract_strided_slice %392 {offsets = [0, 32], sizes = [2, 32], strides = [1, 1]} : vector<2x128xf32> to vector<2x32xf32>
    %cst_122 = arith.constant 5.000000e-01 : f32
    %402 = vector.broadcast %cst_122 : f32 to vector<2x32xf32>
    %403 = arith.mulf %402, %401 : vector<2x32xf32>
    %404 = math.tanh %403 : vector<2x32xf32>
    %cst_123 = arith.constant 1.000000e+00 : f32
    %405 = vector.broadcast %cst_123 : f32 to vector<2x32xf32>
    %406 = arith.addf %404, %405 : vector<2x32xf32>
    %cst_124 = arith.constant 5.000000e-01 : f32
    %407 = vector.broadcast %cst_124 : f32 to vector<2x32xf32>
    %408 = arith.mulf %407, %406 : vector<2x32xf32>
    %409 = vector.extract_strided_slice %392 {offsets = [0, 64], sizes = [2, 32], strides = [1, 1]} : vector<2x128xf32> to vector<2x32xf32>
    %410 = math.tanh %409 : vector<2x32xf32>
    %411 = vector.extract_strided_slice %392 {offsets = [0, 96], sizes = [2, 32], strides = [1, 1]} : vector<2x128xf32> to vector<2x32xf32>
    %cst_125 = arith.constant 5.000000e-01 : f32
    %412 = vector.broadcast %cst_125 : f32 to vector<2x32xf32>
    %413 = arith.mulf %412, %411 : vector<2x32xf32>
    %414 = math.tanh %413 : vector<2x32xf32>
    %cst_126 = arith.constant 1.000000e+00 : f32
    %415 = vector.broadcast %cst_126 : f32 to vector<2x32xf32>
    %416 = arith.addf %414, %415 : vector<2x32xf32>
    %cst_127 = arith.constant 5.000000e-01 : f32
    %417 = vector.broadcast %cst_127 : f32 to vector<2x32xf32>
    %418 = arith.mulf %417, %416 : vector<2x32xf32>
    %419 = arith.mulf %408, %352 : vector<2x32xf32>
    %420 = arith.mulf %400, %410 : vector<2x32xf32>
    %421 = arith.addf %419, %420 : vector<2x32xf32>
    %422 = math.tanh %421 : vector<2x32xf32>
    %423 = arith.mulf %418, %422 : vector<2x32xf32>
    %424 = vector.extract_strided_slice %8 {offsets = [12, 0], sizes = [2, 128], strides = [1, 1]} : vector<16x128xf32> to vector<2x128xf32>
    %cst_128 = arith.constant dense<0.000000e+00> : vector<2x128xf32>
    %425 = tpu.matmul %388, %1, %cst_128 {dimension_numbers = #tpu.dot_dimension_numbers<[1], [0], [0], [1], [0, 0, 1, 1], [], []>} : vector<2x32xf32>, vector<32x128xf32>, vector<2x128xf32> -> vector<2x128xf32>
    %426 = arith.addf %424, %425 : vector<2x128xf32>
    %427 = vector.extract_strided_slice %426 {offsets = [0, 0], sizes = [2, 32], strides = [1, 1]} : vector<2x128xf32> to vector<2x32xf32>
    %cst_129 = arith.constant 5.000000e-01 : f32
    %428 = vector.broadcast %cst_129 : f32 to vector<2x32xf32>
    %429 = arith.mulf %428, %427 : vector<2x32xf32>
    %430 = math.tanh %429 : vector<2x32xf32>
    %cst_130 = arith.constant 1.000000e+00 : f32
    %431 = vector.broadcast %cst_130 : f32 to vector<2x32xf32>
    %432 = arith.addf %430, %431 : vector<2x32xf32>
    %cst_131 = arith.constant 5.000000e-01 : f32
    %433 = vector.broadcast %cst_131 : f32 to vector<2x32xf32>
    %434 = arith.mulf %433, %432 : vector<2x32xf32>
    %435 = vector.extract_strided_slice %426 {offsets = [0, 32], sizes = [2, 32], strides = [1, 1]} : vector<2x128xf32> to vector<2x32xf32>
    %cst_132 = arith.constant 5.000000e-01 : f32
    %436 = vector.broadcast %cst_132 : f32 to vector<2x32xf32>
    %437 = arith.mulf %436, %435 : vector<2x32xf32>
    %438 = math.tanh %437 : vector<2x32xf32>
    %cst_133 = arith.constant 1.000000e+00 : f32
    %439 = vector.broadcast %cst_133 : f32 to vector<2x32xf32>
    %440 = arith.addf %438, %439 : vector<2x32xf32>
    %cst_134 = arith.constant 5.000000e-01 : f32
    %441 = vector.broadcast %cst_134 : f32 to vector<2x32xf32>
    %442 = arith.mulf %441, %440 : vector<2x32xf32>
    %443 = vector.extract_strided_slice %426 {offsets = [0, 64], sizes = [2, 32], strides = [1, 1]} : vector<2x128xf32> to vector<2x32xf32>
    %444 = math.tanh %443 : vector<2x32xf32>
    %445 = vector.extract_strided_slice %426 {offsets = [0, 96], sizes = [2, 32], strides = [1, 1]} : vector<2x128xf32> to vector<2x32xf32>
    %cst_135 = arith.constant 5.000000e-01 : f32
    %446 = vector.broadcast %cst_135 : f32 to vector<2x32xf32>
    %447 = arith.mulf %446, %445 : vector<2x32xf32>
    %448 = math.tanh %447 : vector<2x32xf32>
    %cst_136 = arith.constant 1.000000e+00 : f32
    %449 = vector.broadcast %cst_136 : f32 to vector<2x32xf32>
    %450 = arith.addf %448, %449 : vector<2x32xf32>
    %cst_137 = arith.constant 5.000000e-01 : f32
    %451 = vector.broadcast %cst_137 : f32 to vector<2x32xf32>
    %452 = arith.mulf %451, %450 : vector<2x32xf32>
    %453 = arith.mulf %442, %386 : vector<2x32xf32>
    %454 = arith.mulf %434, %444 : vector<2x32xf32>
    %455 = arith.addf %453, %454 : vector<2x32xf32>
    %456 = math.tanh %455 : vector<2x32xf32>
    %457 = arith.mulf %452, %456 : vector<2x32xf32>
    %458 = tpu.concatenate %457, %423 in 1 : vector<2x32xf32>, vector<2x32xf32> -> vector<2x64xf32>
    %cst_138 = arith.constant dense<0.000000e+00> : vector<2x128xf32>
    %459 = tpu.matmul %458, %3, %cst_138 {dimension_numbers = #tpu.dot_dimension_numbers<[1], [0], [0], [1], [0, 0, 1, 1], [], []>} : vector<2x64xf32>, vector<64x128xf32>, vector<2x128xf32> -> vector<2x128xf32>
    %460 = vector.broadcast %4 : vector<1x128xf32> to vector<2x128xf32>
    %461 = arith.addf %459, %460 : vector<2x128xf32>
    %462 = vector.extract_strided_slice %461 {offsets = [0, 0], sizes = [2, 32], strides = [1, 1]} : vector<2x128xf32> to vector<2x32xf32>
    %cst_139 = arith.constant 5.000000e-01 : f32
    %463 = vector.broadcast %cst_139 : f32 to vector<2x32xf32>
    %464 = arith.mulf %463, %462 : vector<2x32xf32>
    %465 = math.tanh %464 : vector<2x32xf32>
    %cst_140 = arith.constant 1.000000e+00 : f32
    %466 = vector.broadcast %cst_140 : f32 to vector<2x32xf32>
    %467 = arith.addf %465, %466 : vector<2x32xf32>
    %cst_141 = arith.constant 5.000000e-01 : f32
    %468 = vector.broadcast %cst_141 : f32 to vector<2x32xf32>
    %469 = arith.mulf %468, %467 : vector<2x32xf32>
    %470 = vector.extract_strided_slice %461 {offsets = [0, 32], sizes = [2, 32], strides = [1, 1]} : vector<2x128xf32> to vector<2x32xf32>
    %cst_142 = arith.constant 5.000000e-01 : f32
    %471 = vector.broadcast %cst_142 : f32 to vector<2x32xf32>
    %472 = arith.mulf %471, %470 : vector<2x32xf32>
    %473 = math.tanh %472 : vector<2x32xf32>
    %cst_143 = arith.constant 1.000000e+00 : f32
    %474 = vector.broadcast %cst_143 : f32 to vector<2x32xf32>
    %475 = arith.addf %473, %474 : vector<2x32xf32>
    %cst_144 = arith.constant 5.000000e-01 : f32
    %476 = vector.broadcast %cst_144 : f32 to vector<2x32xf32>
    %477 = arith.mulf %476, %475 : vector<2x32xf32>
    %478 = vector.extract_strided_slice %461 {offsets = [0, 64], sizes = [2, 32], strides = [1, 1]} : vector<2x128xf32> to vector<2x32xf32>
    %479 = math.tanh %478 : vector<2x32xf32>
    %480 = vector.extract_strided_slice %461 {offsets = [0, 96], sizes = [2, 32], strides = [1, 1]} : vector<2x128xf32> to vector<2x32xf32>
    %cst_145 = arith.constant 5.000000e-01 : f32
    %481 = vector.broadcast %cst_145 : f32 to vector<2x32xf32>
    %482 = arith.mulf %481, %480 : vector<2x32xf32>
    %483 = math.tanh %482 : vector<2x32xf32>
    %cst_146 = arith.constant 1.000000e+00 : f32
    %484 = vector.broadcast %cst_146 : f32 to vector<2x32xf32>
    %485 = arith.addf %483, %484 : vector<2x32xf32>
    %cst_147 = arith.constant 5.000000e-01 : f32
    %486 = vector.broadcast %cst_147 : f32 to vector<2x32xf32>
    %487 = arith.mulf %486, %485 : vector<2x32xf32>
    %488 = arith.mulf %477, %421 : vector<2x32xf32>
    %489 = arith.mulf %469, %479 : vector<2x32xf32>
    %490 = arith.addf %488, %489 : vector<2x32xf32>
    %491 = math.tanh %490 : vector<2x32xf32>
    %492 = arith.mulf %487, %491 : vector<2x32xf32>
    %493 = vector.extract_strided_slice %8 {offsets = [14, 0], sizes = [2, 128], strides = [1, 1]} : vector<16x128xf32> to vector<2x128xf32>
    %cst_148 = arith.constant dense<0.000000e+00> : vector<2x128xf32>
    %494 = tpu.matmul %457, %1, %cst_148 {dimension_numbers = #tpu.dot_dimension_numbers<[1], [0], [0], [1], [0, 0, 1, 1], [], []>} : vector<2x32xf32>, vector<32x128xf32>, vector<2x128xf32> -> vector<2x128xf32>
    %495 = arith.addf %493, %494 : vector<2x128xf32>
    %496 = vector.extract_strided_slice %495 {offsets = [0, 0], sizes = [2, 32], strides = [1, 1]} : vector<2x128xf32> to vector<2x32xf32>
    %cst_149 = arith.constant 5.000000e-01 : f32
    %497 = vector.broadcast %cst_149 : f32 to vector<2x32xf32>
    %498 = arith.mulf %497, %496 : vector<2x32xf32>
    %499 = math.tanh %498 : vector<2x32xf32>
    %cst_150 = arith.constant 1.000000e+00 : f32
    %500 = vector.broadcast %cst_150 : f32 to vector<2x32xf32>
    %501 = arith.addf %499, %500 : vector<2x32xf32>
    %cst_151 = arith.constant 5.000000e-01 : f32
    %502 = vector.broadcast %cst_151 : f32 to vector<2x32xf32>
    %503 = arith.mulf %502, %501 : vector<2x32xf32>
    %504 = vector.extract_strided_slice %495 {offsets = [0, 32], sizes = [2, 32], strides = [1, 1]} : vector<2x128xf32> to vector<2x32xf32>
    %cst_152 = arith.constant 5.000000e-01 : f32
    %505 = vector.broadcast %cst_152 : f32 to vector<2x32xf32>
    %506 = arith.mulf %505, %504 : vector<2x32xf32>
    %507 = math.tanh %506 : vector<2x32xf32>
    %cst_153 = arith.constant 1.000000e+00 : f32
    %508 = vector.broadcast %cst_153 : f32 to vector<2x32xf32>
    %509 = arith.addf %507, %508 : vector<2x32xf32>
    %cst_154 = arith.constant 5.000000e-01 : f32
    %510 = vector.broadcast %cst_154 : f32 to vector<2x32xf32>
    %511 = arith.mulf %510, %509 : vector<2x32xf32>
    %512 = vector.extract_strided_slice %495 {offsets = [0, 64], sizes = [2, 32], strides = [1, 1]} : vector<2x128xf32> to vector<2x32xf32>
    %513 = math.tanh %512 : vector<2x32xf32>
    %514 = vector.extract_strided_slice %495 {offsets = [0, 96], sizes = [2, 32], strides = [1, 1]} : vector<2x128xf32> to vector<2x32xf32>
    %cst_155 = arith.constant 5.000000e-01 : f32
    %515 = vector.broadcast %cst_155 : f32 to vector<2x32xf32>
    %516 = arith.mulf %515, %514 : vector<2x32xf32>
    %517 = math.tanh %516 : vector<2x32xf32>
    %cst_156 = arith.constant 1.000000e+00 : f32
    %518 = vector.broadcast %cst_156 : f32 to vector<2x32xf32>
    %519 = arith.addf %517, %518 : vector<2x32xf32>
    %cst_157 = arith.constant 5.000000e-01 : f32
    %520 = vector.broadcast %cst_157 : f32 to vector<2x32xf32>
    %521 = arith.mulf %520, %519 : vector<2x32xf32>
    %522 = arith.mulf %511, %455 : vector<2x32xf32>
    %523 = arith.mulf %503, %513 : vector<2x32xf32>
    %524 = arith.addf %522, %523 : vector<2x32xf32>
    %525 = math.tanh %524 : vector<2x32xf32>
    %526 = arith.mulf %521, %525 : vector<2x32xf32>
    %527 = tpu.concatenate %526, %492 in 1 : vector<2x32xf32>, vector<2x32xf32> -> vector<2x64xf32>
    %cst_158 = arith.constant dense<0.000000e+00> : vector<2x128xf32>
    %528 = tpu.matmul %527, %3, %cst_158 {dimension_numbers = #tpu.dot_dimension_numbers<[1], [0], [0], [1], [0, 0, 1, 1], [], []>} : vector<2x64xf32>, vector<64x128xf32>, vector<2x128xf32> -> vector<2x128xf32>
    %529 = vector.broadcast %4 : vector<1x128xf32> to vector<2x128xf32>
    %530 = arith.addf %528, %529 : vector<2x128xf32>
    %531 = vector.extract_strided_slice %530 {offsets = [0, 0], sizes = [2, 32], strides = [1, 1]} : vector<2x128xf32> to vector<2x32xf32>
    %cst_159 = arith.constant 5.000000e-01 : f32
    %532 = vector.broadcast %cst_159 : f32 to vector<2x32xf32>
    %533 = arith.mulf %532, %531 : vector<2x32xf32>
    %534 = math.tanh %533 : vector<2x32xf32>
    %cst_160 = arith.constant 1.000000e+00 : f32
    %535 = vector.broadcast %cst_160 : f32 to vector<2x32xf32>
    %536 = arith.addf %534, %535 : vector<2x32xf32>
    %cst_161 = arith.constant 5.000000e-01 : f32
    %537 = vector.broadcast %cst_161 : f32 to vector<2x32xf32>
    %538 = arith.mulf %537, %536 : vector<2x32xf32>
    %539 = vector.extract_strided_slice %530 {offsets = [0, 32], sizes = [2, 32], strides = [1, 1]} : vector<2x128xf32> to vector<2x32xf32>
    %cst_162 = arith.constant 5.000000e-01 : f32
    %540 = vector.broadcast %cst_162 : f32 to vector<2x32xf32>
    %541 = arith.mulf %540, %539 : vector<2x32xf32>
    %542 = math.tanh %541 : vector<2x32xf32>
    %cst_163 = arith.constant 1.000000e+00 : f32
    %543 = vector.broadcast %cst_163 : f32 to vector<2x32xf32>
    %544 = arith.addf %542, %543 : vector<2x32xf32>
    %cst_164 = arith.constant 5.000000e-01 : f32
    %545 = vector.broadcast %cst_164 : f32 to vector<2x32xf32>
    %546 = arith.mulf %545, %544 : vector<2x32xf32>
    %547 = vector.extract_strided_slice %530 {offsets = [0, 64], sizes = [2, 32], strides = [1, 1]} : vector<2x128xf32> to vector<2x32xf32>
    %548 = math.tanh %547 : vector<2x32xf32>
    %549 = vector.extract_strided_slice %530 {offsets = [0, 96], sizes = [2, 32], strides = [1, 1]} : vector<2x128xf32> to vector<2x32xf32>
    %cst_165 = arith.constant 5.000000e-01 : f32
    %550 = vector.broadcast %cst_165 : f32 to vector<2x32xf32>
    %551 = arith.mulf %550, %549 : vector<2x32xf32>
    %552 = math.tanh %551 : vector<2x32xf32>
    %cst_166 = arith.constant 1.000000e+00 : f32
    %553 = vector.broadcast %cst_166 : f32 to vector<2x32xf32>
    %554 = arith.addf %552, %553 : vector<2x32xf32>
    %cst_167 = arith.constant 5.000000e-01 : f32
    %555 = vector.broadcast %cst_167 : f32 to vector<2x32xf32>
    %556 = arith.mulf %555, %554 : vector<2x32xf32>
    %557 = arith.mulf %546, %490 : vector<2x32xf32>
    %558 = arith.mulf %538, %548 : vector<2x32xf32>
    %559 = arith.addf %557, %558 : vector<2x32xf32>
    %560 = math.tanh %559 : vector<2x32xf32>
    %561 = arith.mulf %556, %560 : vector<2x32xf32>
    %c144 = arith.constant 144 : index
    %c0_168 = arith.constant 0 : index
    %562 = vector.load %arg0[%c144, %c0_168] : memref<224x128xf32, #tpu.memory_space<vmem>>, vector<32x128xf32>
    %c176 = arith.constant 176 : index
    %c0_169 = arith.constant 0 : index
    %563 = vector.load %arg0[%c176, %c0_169] : memref<224x128xf32, #tpu.memory_space<vmem>>, vector<1x128xf32>
    %c184 = arith.constant 184 : index
    %c0_170 = arith.constant 0 : index
    %564 = vector.load %arg0[%c184, %c0_170] : memref<224x128xf32, #tpu.memory_space<vmem>>, vector<32x128xf32>
    %c216 = arith.constant 216 : index
    %c0_171 = arith.constant 0 : index
    %565 = vector.load %arg0[%c216, %c0_171] : memref<224x128xf32, #tpu.memory_space<vmem>>, vector<1x128xf32>
    %cst_172 = arith.constant dense<0.000000e+00> : vector<2x128xf32>
    %566 = tpu.matmul %561, %562, %cst_172 {dimension_numbers = #tpu.dot_dimension_numbers<[1], [0], [0], [1], [0, 0, 1, 1], [], []>} : vector<2x32xf32>, vector<32x128xf32>, vector<2x128xf32> -> vector<2x128xf32>
    %567 = vector.broadcast %563 : vector<1x128xf32> to vector<2x128xf32>
    %568 = arith.addf %566, %567 : vector<2x128xf32>
    %569 = vector.extract_strided_slice %568 {offsets = [0, 0], sizes = [2, 32], strides = [1, 1]} : vector<2x128xf32> to vector<2x32xf32>
    %cst_173 = arith.constant dense<0.000000e+00> : vector<2x128xf32>
    %570 = tpu.matmul %569, %564, %cst_173 {dimension_numbers = #tpu.dot_dimension_numbers<[1], [0], [0], [1], [0, 0, 1, 1], [], []>} : vector<2x32xf32>, vector<32x128xf32>, vector<2x128xf32> -> vector<2x128xf32>
    %571 = vector.broadcast %565 : vector<1x128xf32> to vector<2x128xf32>
    %572 = arith.addf %570, %571 : vector<2x128xf32>
    %573 = tpu.iota {dimensions = array<i32: 1>} : vector<2x128xi32>
    %c3_i32 = arith.constant 3 : i32
    %574 = vector.broadcast %c3_i32 : i32 to vector<2x128xi32>
    %575 = arith.cmpi slt, %573, %574 : vector<2x128xi32>
    %cst_174 = arith.constant 0xFF800000 : f32
    %576 = vector.broadcast %cst_174 : f32 to vector<2x128xf32>
    %577 = arith.select %575, %572, %576 : vector<2x128xi1>, vector<2x128xf32>
    %cst_175 = arith.constant dense<0xFF800000> : vector<2xf32>
    %578 = vector.multi_reduction <maximumf>, %577, %cst_175 [1] : vector<2x128xf32> to vector<2xf32>
    %579 = vector.shape_cast %578 : vector<2xf32> to vector<2x1xf32>
    %580 = vector.broadcast %579 : vector<2x1xf32> to vector<2x128xf32>
    %581 = arith.subf %577, %580 : vector<2x128xf32>
    %582 = math.exp %581 : vector<2x128xf32>
    %cst_176 = arith.constant dense<0.000000e+00> : vector<2xf32>
    %583 = vector.multi_reduction <add>, %582, %cst_176 [1] : vector<2x128xf32> to vector<2xf32>
    %584 = vector.shape_cast %583 : vector<2xf32> to vector<2x1xf32>
    %585 = vector.broadcast %584 : vector<2x1xf32> to vector<2x128xf32>
    %586 = arith.divf %582, %585 : vector<2x128xf32>
    %587 = tpu.iota {dimensions = array<i32: 0>} : vector<16x128xi32>
    %588 = vector.extract_strided_slice %586 {offsets = [0, 0], sizes = [1, 128], strides = [1, 1]} : vector<2x128xf32> to vector<1x128xf32>
    %589 = vector.shape_cast %588 : vector<1x128xf32> to vector<1x128xf32>
    %590 = vector.broadcast %589 : vector<1x128xf32> to vector<16x128xf32>
    %c8_i32 = arith.constant 8 : i32
    %591 = vector.broadcast %c8_i32 : i32 to vector<16x128xi32>
    %592 = arith.cmpi sge, %587, %591 : vector<16x128xi32>
    %593 = vector.extract_strided_slice %586 {offsets = [1, 0], sizes = [1, 128], strides = [1, 1]} : vector<2x128xf32> to vector<1x128xf32>
    %594 = vector.shape_cast %593 : vector<1x128xf32> to vector<1x128xf32>
    %595 = vector.broadcast %594 : vector<1x128xf32> to vector<16x128xf32>
    %596 = arith.select %592, %595, %590 : vector<16x128xi1>, vector<16x128xf32>
    %c0_177 = arith.constant 0 : index
    %c0_178 = arith.constant 0 : index
    %c0_179 = arith.constant 0 : index
    %597 = vector.load %arg2[%c0_177, %c0_178, %c0_179] : memref<4x16x128xf32, #tpu.memory_space<vmem>>, vector<1x16x128xf32>
    %598 = vector.shape_cast %597 : vector<1x16x128xf32> to vector<16x128xf32>
    %c1 = arith.constant 1 : index
    %c0_180 = arith.constant 0 : index
    %c0_181 = arith.constant 0 : index
    %599 = vector.load %arg2[%c1, %c0_180, %c0_181] : memref<4x16x128xf32, #tpu.memory_space<vmem>>, vector<1x16x128xf32>
    %600 = vector.shape_cast %599 : vector<1x16x128xf32> to vector<16x128xf32>
    %601 = arith.maximumf %598, %600 : vector<16x128xf32>
    %c2 = arith.constant 2 : index
    %c0_182 = arith.constant 0 : index
    %c0_183 = arith.constant 0 : index
    %602 = vector.load %arg2[%c2, %c0_182, %c0_183] : memref<4x16x128xf32, #tpu.memory_space<vmem>>, vector<1x16x128xf32>
    %603 = vector.shape_cast %602 : vector<1x16x128xf32> to vector<16x128xf32>
    %604 = arith.maximumf %601, %603 : vector<16x128xf32>
    %cst_184 = arith.constant 0.000000e+00 : f32
    %605 = vector.broadcast %cst_184 : f32 to vector<16x128xf32>
    %c0_185 = arith.constant 0 : index
    %c0_186 = arith.constant 0 : index
    %c0_187 = arith.constant 0 : index
    %606 = vector.load %arg2[%c0_185, %c0_186, %c0_187] : memref<4x16x128xf32, #tpu.memory_space<vmem>>, vector<1x16x128xf32>
    %607 = vector.shape_cast %606 : vector<1x16x128xf32> to vector<16x128xf32>
    %608 = arith.subf %607, %604 : vector<16x128xf32>
    %609 = math.exp %608 : vector<16x128xf32>
    %610 = vector.extract_strided_slice %596 {offsets = [0, 0], sizes = [16, 1], strides = [1, 1]} : vector<16x128xf32> to vector<16x1xf32>
    %611 = vector.broadcast %610 : vector<16x1xf32> to vector<16x128xf32>
    %612 = arith.mulf %609, %611 : vector<16x128xf32>
    %613 = arith.addf %605, %612 : vector<16x128xf32>
    %c1_188 = arith.constant 1 : index
    %c0_189 = arith.constant 0 : index
    %c0_190 = arith.constant 0 : index
    %614 = vector.load %arg2[%c1_188, %c0_189, %c0_190] : memref<4x16x128xf32, #tpu.memory_space<vmem>>, vector<1x16x128xf32>
    %615 = vector.shape_cast %614 : vector<1x16x128xf32> to vector<16x128xf32>
    %616 = arith.subf %615, %604 : vector<16x128xf32>
    %617 = math.exp %616 : vector<16x128xf32>
    %618 = vector.extract_strided_slice %596 {offsets = [0, 1], sizes = [16, 1], strides = [1, 1]} : vector<16x128xf32> to vector<16x1xf32>
    %619 = vector.broadcast %618 : vector<16x1xf32> to vector<16x128xf32>
    %620 = arith.mulf %617, %619 : vector<16x128xf32>
    %621 = arith.addf %613, %620 : vector<16x128xf32>
    %c2_191 = arith.constant 2 : index
    %c0_192 = arith.constant 0 : index
    %c0_193 = arith.constant 0 : index
    %622 = vector.load %arg2[%c2_191, %c0_192, %c0_193] : memref<4x16x128xf32, #tpu.memory_space<vmem>>, vector<1x16x128xf32>
    %623 = vector.shape_cast %622 : vector<1x16x128xf32> to vector<16x128xf32>
    %624 = arith.subf %623, %604 : vector<16x128xf32>
    %625 = math.exp %624 : vector<16x128xf32>
    %626 = vector.extract_strided_slice %596 {offsets = [0, 2], sizes = [16, 1], strides = [1, 1]} : vector<16x128xf32> to vector<16x1xf32>
    %627 = vector.broadcast %626 : vector<16x1xf32> to vector<16x128xf32>
    %628 = arith.mulf %625, %627 : vector<16x128xf32>
    %629 = arith.addf %621, %628 : vector<16x128xf32>
    %630 = math.log %629 : vector<16x128xf32>
    %631 = arith.addf %604, %630 : vector<16x128xf32>
    %c0_194 = arith.constant 0 : index
    %c0_195 = arith.constant 0 : index
    %632 = vector.load %arg3[%c0_194, %c0_195] : memref<16x128xf32, #tpu.memory_space<vmem>>, vector<16x128xf32>
    tpu.vector_store %arg3[%c0_194, %c0_195], %631 {strides = array<i32>} : memref<16x128xf32, #tpu.memory_space<vmem>>, vector<16x128xf32>,
    %c3 = arith.constant 3 : index
    %c0_196 = arith.constant 0 : index
    %c0_197 = arith.constant 0 : index
    %633 = vector.load %arg2[%c3, %c0_196, %c0_197] : memref<4x16x128xf32, #tpu.memory_space<vmem>>, vector<1x16x128xf32>
    %634 = vector.shape_cast %633 : vector<1x16x128xf32> to vector<16x128xf32>
    %635 = vector.extract_strided_slice %634 {offsets = [0, 0], sizes = [16, 1], strides = [1, 1]} : vector<16x128xf32> to vector<16x1xf32>
    %636 = arith.fptosi %635 : vector<16x1xf32> to vector<16x1xi32>
    %637 = tpu.iota {dimensions = array<i32: 1>} : vector<16x128xi32>
    %638 = vector.broadcast %636 : vector<16x1xi32> to vector<16x128xi32>
    %639 = arith.cmpi eq, %637, %638 : vector<16x128xi32>
    %cst_198 = arith.constant 0.000000e+00 : f32
    %640 = vector.broadcast %cst_198 : f32 to vector<16x128xf32>
    %641 = arith.select %639, %631, %640 : vector<16x128xi1>, vector<16x128xf32>
    %cst_199 = arith.constant dense<0.000000e+00> : vector<16xf32>
    %642 = vector.multi_reduction <add>, %641, %cst_199 [1] : vector<16x128xf32> to vector<16xf32>
    %643 = vector.shape_cast %642 : vector<16xf32> to vector<16x1xf32>
    %c1_i32 = arith.constant 1 : i32
    %644 = vector.broadcast %c1_i32 : i32 to vector<16x1xi32>
    %645 = arith.cmpi ne, %636, %644 : vector<16x1xi32>
    %cst_200 = arith.constant 0.000000e+00 : f32
    %646 = vector.broadcast %cst_200 : f32 to vector<16x1xf32>
    %647 = arith.select %645, %643, %646 : vector<16x1xi1>, vector<16x1xf32>
    %648 = vector.shape_cast %647 : vector<16x1xf32> to vector<1x16x1xf32>
    %cst_201 = arith.constant dense<0.000000e+00> : vector<1xf32>
    %649 = vector.multi_reduction <add>, %648, %cst_201 [1, 2] : vector<1x16x1xf32> to vector<1xf32>
    %650 = vector.shape_cast %649 : vector<1xf32> to vector<1x1x1xf32>
    %651 = vector.extract %650[0, 0, 0] : f32 from vector<1x1x1xf32>
    %652 = arith.extui %645 : vector<16x1xi1> to vector<16x1xi32>
    %653 = arith.sitofp %652 : vector<16x1xi32> to vector<16x1xf32>
    %654 = vector.shape_cast %653 : vector<16x1xf32> to vector<1x16x1xf32>
    %cst_202 = arith.constant dense<0.000000e+00> : vector<1xf32>
    %655 = vector.multi_reduction <add>, %654, %cst_202 [1, 2] : vector<1x16x1xf32> to vector<1xf32>
    %656 = vector.shape_cast %655 : vector<1xf32> to vector<1x1x1xf32>
    %657 = vector.extract %656[0, 0, 0] : f32 from vector<1x1x1xf32>
    %cst_203 = arith.constant 1.000000e+00 : f32
    %658 = arith.maximumf %657, %cst_203 : f32
    %659 = arith.divf %651, %658 : f32
    %cst_204 = arith.constant 0.000000e+00 : f32
    %660 = arith.subf %cst_204, %659 : f32
    %661 = vector.broadcast %660 : f32 to vector<1x1xf32>
    %c0_205 = arith.constant 0 : index
    %c0_206 = arith.constant 0 : index
    %662 = vector.load %arg4[%c0_205, %c0_206] : memref<1x1xf32, #tpu.memory_space<vmem>>, vector<1x1xf32>
    tpu.vector_store %arg4[%c0_205, %c0_206], %661 {strides = array<i32>} : memref<1x1xf32, #tpu.memory_space<vmem>>, vector<1x1xf32>,
    return
  }
}

</mosaic_0001>

<bundles_post_ra>
// kernel: _beta_forward.1
= control target key start
LH: loop header
LB: loop body
LE: loop exit
PB: predicated region body
PF: predicated region fallthrough
CT: control target
= control target key end

     0   :  { %v2742_v3 = vmov 0.0   ;;  %vm41_vm0 = vcmask 261120   ;;  %s3367_s0 = inlined_call_operand.vmem [shape: f32[224,128], index: 0, kind: input, shape index: {}]   ;;  %s3368_s1 = inlined_call_operand.vmem [shape: f32[16,32], index: 1, kind: input, shape index: {}]   ;;  %s3369_s2 = inlined_call_operand.vmem [shape: f32[4,16,128], index: 2, kind: input, shape index: {}]   ;;  %s3370_s3 = inlined_call_operand.vmem [shape: f32[16,128], index: 3, kind: output, shape index: {0}]   ;;  %s3371_s4 = inlined_call_operand.hbm [shape: f32[1,1], index: 4, kind: output, shape index: {1}]  }
   0x1   :  { %v20_v0 = vld [vmem:[%s3367_s0 + $0x18] sm:$0xff]  ;;  %v19_v1 = vld [vmem:[%s3367_s0 + $0x10] sm:$0xff]  ;;  %2305 = vmatprep.subr.mxu1 %v2742_v3  ;;  %v18_v5 = vld [vmem:[%s3367_s0 + $0x8] sm:$0xff] }
   0x2   :  { %v2785_v2 = vld [vmem:[%s3367_s0 + $0x38] sm:$0xff]  ;;  %2294 = vmatprep.subr.mxu0 %v20_v0  ;;  %v2791_v4 = vld [vmem:[%s3367_s0 + $0x30] sm:$0xff]  ;;  %v35_v6 = vld [vmem:[%s3368_s1] sm:$0xff] }
   0x3   :  { %2295 = vmatpush3.msra.mxu0 %v20_v0  ;;  %2306 = vmatpush3.msra.mxu1 %v2785_v2 }
   0x4   :  { %2296 = vmatprep.subr.mxu0 %v19_v1  ;;  %2307 = vmatprep.subr.mxu1 %v2742_v3 }
   0x5   :  { %10 = vsyncpa [#allocation3], 0  ;;  %2297 = vmatpush3.msra.mxu0 %v19_v1  ;;  %2308 = vmatpush3.msra.mxu1 %v2791_v4  ;;  %v17_v7 = vld [vmem:[%s3367_s0] sm:$0xff]  ;;  %v2808_v8 = vld [vmem:[%s3367_s0 + $0x28] sm:$0xff]  ;;  %vm2743_vm1 = vmmov 0   ;;  %s2744_s10 = smov 64  }
   0x6   :  { %2298 = vmatprep.subr.mxu0 %v18_v5  ;;  %2309 = vmatprep.subr.mxu1 %v2742_v3  ;;  %v36_v9 = vld [vmem:[%s3368_s1 + $0x8] sm:$0xff]  ;;  %v2818_v10 = vld [vmem:[%s3367_s0 + $0x20] sm:$0xff]  ;;  %s2745_s11 = smov 32   ;;  %v2862_v30 = vld [vmem:[%s3367_s0 + $0x78] sm:$0xff]  ;;  %vm228_vm2 = vcmask 523264   ;;  %vm1953_vm4 = vcmask 1041408  }
   0x7   :  { %2299 = vmatpush3.msra.mxu0 %v18_v5  ;;  %2302 = vmatprep.mubr.msk.f32.mxu0 %vm41_vm0, %v35_v6  ;;  %v2135_v11 = vld [vmem:[%s3367_s0 + $0x40] ss:$0 sm:$0xff]  ;;  %v2869_v31 = vld [vmem:[%s3367_s0 + $0x70] sm:$0xff]  ;;  %v2876_v32 = vld [vmem:[%s3367_s0 + $0x68] sm:$0xff]  ;;  %vm2079_vm8 = vcmask 7168   ;;  %s2750_s16 = smov [#allocation2]  }
   0x8   :  { %2300 = vmatprep.subr.mxu0 %v17_v7  ;;  %2310 = vmatpush3.msra.mxu1 %v2808_v8  ;;  %v2857_v29 = vld [vmem:[%s3367_s0 + $0x80] sm:$0xff]  ;;  %v2890_v34 = vld [vmem:[%s3367_s0 + $0x58] sm:$0xff]  ;;  %v2897_v36 = vld [vmem:[%s3367_s0 + $0x50] sm:$0xff]  ;;  %s2125_s17 = sshll.u32 %s2750_s16, 4  ;;  %vm2115_vm10 = vcmask 0   ;;  %s2126_s17 = int_to_ptr.vmem [resolvable:$true] %s2125_s17 }
   0x9   :  { %2301 = vmatpush3.msra.mxu0 %v17_v7  ;;  %2311 = vmatprep.subr.mxu1 %v2742_v3  ;;  %v2883_v33 = vld [vmem:[%s3367_s0 + $0x60] sm:$0xff]  ;;  %v2907_v37 = vld [vmem:[%s3367_s0 + $0x48] sm:$0xff]  ;;  %s2720_s19 = scalar_lea.vmem %s2126_s17, 16  ;;  %p2725_p1 = scmp.lt.s32.totalorder %s2126_s17, %s2126_s17 }
   0xa   :  { %2303 = vmatmul.mubr.msk.f32.vlgmr.msra.gmra.mxu0 %vm41_vm0, %v36_v9  ;;  %2312 = vmatpush3.msra.mxu1 %v2818_v10  ;;  %v2946_v42 = vld [vmem:[%s3367_s0 + $0x88] ss:$0 sm:$0xff]  ;;  %p2721_p0 = scmp.ne.s32.totalorder %s2126_s17, %s2720_s19 }
   0xb   :  { %2313 = vmatprep.mubr.msk.f32.mxu1 %vm2743_vm1, %v2742_v3  ;;  %2316 = vmatprep.subr.mxu0 %v2742_v3 }
   0xc   :  { %2314 = vmatmul.mubr.f32.vlgmr.msra.gmra.mxu1 %v2742_v3  ;;  %2335 = vmatprep.subr.mxu1 %v2742_v3 }
   0xd   :  { %2336 = vmatpush3.msra.mxu1 %v2785_v2  ;;  %2343 = vmatprep.mubr.msk.f32.mxu1 %vm2743_vm1, %v2742_v3 }
   0xe   :  { %2337 = vmatprep.subr.mxu1 %v2742_v3  ;;  %2332 = vmatprep.mubr.msk.f32.mxu0 %vm2743_vm1, %v2742_v3 }
   0xf   :  { %2338 = vmatpush3.msra.mxu1 %v2791_v4  ;;  %2317 = vmatpush3.msra.mxu0 %v2857_v29 }
  0x10   :  { %2339 = vmatprep.subr.mxu1 %v2742_v3  ;;  %2318 = vmatprep.subr.mxu0 %v2742_v3 }
  0x11   :  { %2340 = vmatpush3.msra.mxu1 %v2808_v8  ;;  %2319 = vmatpush3.msra.mxu0 %v2862_v30 }
  0x12   :  { %2341 = vmatprep.subr.mxu1 %v2742_v3  ;;  %2320 = vmatprep.subr.mxu0 %v2742_v3 }
  0x13   :  { %2342 = vmatpush3.msra.mxu1 %v2818_v10  ;;  %2321 = vmatpush3.msra.mxu0 %v2869_v31 }
  0x14   :  { %2346 = vmatprep.subr.mxu1 %v2742_v3  ;;  %2322 = vmatprep.subr.mxu0 %v2742_v3 }
  0x15   :  { %2323 = vmatpush3.msra.mxu0 %v2876_v32 }
  0x16   :  { %2324 = vmatprep.subr.mxu0 %v2742_v3 }
  0x17   :  { %2325 = vmatpush3.msra.mxu0 %v2883_v33 }
  0x18   :  { %2326 = vmatprep.subr.mxu0 %v2742_v3 }
  0x19   :  { %2327 = vmatpush3.msra.mxu0 %v2890_v34 }
  0x1a   :  { %2328 = vmatprep.subr.mxu0 %v2742_v3 }
  0x1b   :  { %2329 = vmatpush3.msra.mxu0 %v2897_v36 }
  0x1c   :  { %2330 = vmatprep.subr.mxu0 %v2742_v3 }
  0x1d   :  { %2331 = vmatpush3.msra.mxu0 %v2907_v37 }
  0x1e   :  { %2365 = vmatprep.subr.mxu0 %v2742_v3 }
  0xca   :  { %v2304_v12 = vpop.f32.mrf.mxu0 }
  0xcb   :  { %v2844_v13 = vadd.f32 %v2304_v12, %v2135_v11 }
  0xcc   :  { %v114_v14 = vpop.f32.mrf.mxu0  ;;  %v192_v15 = vpop.f32.mrf.mxu1 }
  0xcd   :  { %v2846_v16 = vadd.f32 %v2135_v11, %v114_v14 }
  0xce   :  { %v2315_v17 = vpop.f32.mrf.mxu1 }
  0xcf   :  { %v196_v18 = vadd.f32 %v192_v15, %v2846_v16 }
  0xd1   :  { %2591 = vtanh.f32 %v196_v18  ;;  %v197_v20 = vmul.f32 0.5, %v196_v18 }
  0xd3   :  { %2593 = vtanh.f32 %v197_v20 }
  0xde   :  { %v2592_v19 = vpop.eup %2591 }
  0xdf   :  { %204 = vrot.lane.b32.xlu0 %v2592_v19, %s2744_s10 }
  0xe0   :  { %v2594_v21 = vpop.eup %2593 }
  0xe1   :  { %v199_v22 = vadd.f32 1.0, %v2594_v21 }
  0xe3   :  { %v200_v23 = vmul.f32 0.5, %v199_v22 }
  0xe5   :  { %v202_v26 = vmul.f32 0.0, %v200_v23 }
 0x151   :  { %v205_v24 = vpop.permute.xlu0 %204 }
 0x152   :  { %v207_v25 = vmul.f32 %v205_v24, %v200_v23 }
 0x154   :  { %209 = vrot.lane.b32.xlu0 %v207_v25, %s2745_s11 }
 0x1c6   :  { %v210_v27 = vpop.permute.xlu0 %209 }
 0x1c7   :  { %v2851_v28 = vadd.f32 %v210_v27, %v202_v26 }
 0x1c9   :  { %2595 = vtanh.f32 %v2851_v28  ;;  %v406_v0 = vrot.slane %v2851_v28, 6 }
 0x1d6   :  { %v2596_v35 = vpop.eup %2595 }
 0x1d7   :  { %215 = vrot.lane.b32.xlu1 %v2596_v35, %s2744_s10 }
 0x249   :  { %v216_v38 = vpop.permute.xlu1 %215 }
 0x24a   :  { %v218_v39 = vmul.f32 %v216_v38, %v200_v23 }
 0x24c   :  { %220 = vrot.lane.b32.xlu1 %v218_v39, %s2745_s11 }
 0x2be   :  { %v221_v40 = vpop.permute.xlu1 %220 }
 0x2bf   :  { %v223_v41 = vsel %vm41_vm0, %v221_v40, 0.0  ;;  %2344 = vmatmul.mubr.msk.f32.vlgmr.msra.gmra.mxu1 %vm41_vm0, %v221_v40 }
 0x2c0   :  { %2333 = vmatmul.mubr.msk.f32.vlgmr.msra.gmra.mxu0 %vm228_vm2, %v223_v41  ;;  %2347 = vmatpush3.msra.mxu1 %v2857_v29 }
 0x2c1   :  { %2348 = vmatprep.subr.mxu1 %v2742_v3  ;;  %2366 = vmatpush3.msra.mxu0 %v2785_v2 }
 0x2c2   :  { %2349 = vmatpush3.msra.mxu1 %v2862_v30  ;;  %2367 = vmatprep.subr.mxu0 %v2742_v3 }
 0x2c3   :  { %2350 = vmatprep.subr.mxu1 %v2742_v3  ;;  %2368 = vmatpush3.msra.mxu0 %v2791_v4 }
 0x2c4   :  { %2351 = vmatpush3.msra.mxu1 %v2869_v31  ;;  %2369 = vmatprep.subr.mxu0 %v2742_v3 }
 0x2c5   :  { %2352 = vmatprep.subr.mxu1 %v2742_v3  ;;  %2370 = vmatpush3.msra.mxu0 %v2808_v8 }
 0x2c6   :  { %2353 = vmatpush3.msra.mxu1 %v2876_v32  ;;  %2371 = vmatprep.subr.mxu0 %v2742_v3 }
 0x2c7   :  { %2354 = vmatprep.subr.mxu1 %v2742_v3  ;;  %2362 = vmatprep.mubr.msk.f32.mxu1 %vm2743_vm1, %v2742_v3 }
 0x2c8   :  { %2355 = vmatpush3.msra.mxu1 %v2883_v33  ;;  %2372 = vmatpush3.msra.mxu0 %v2818_v10 }
 0x2c9   :  { %2356 = vmatprep.subr.mxu1 %v2742_v3  ;;  %2373 = vmatprep.mubr.msk.f32.mxu0 %vm2743_vm1, %v2742_v3 }
 0x2ca   :  { %2357 = vmatpush3.msra.mxu1 %v2890_v34  ;;  %2376 = vmatprep.subr.mxu0 %v2742_v3 }
 0x2cb   :  { %2358 = vmatprep.subr.mxu1 %v2742_v3 }
 0x2cc   :  { %2359 = vmatpush3.msra.mxu1 %v2897_v36 }
 0x2cd   :  { %2360 = vmatprep.subr.mxu1 %v2742_v3 }
 0x2ce   :  { %2361 = vmatpush3.msra.mxu1 %v2907_v37 }
 0x2cf   :  { %2395 = vmatprep.subr.mxu1 %v2742_v3 }
 0x37f   :  { %v392_v43 = vpop.f32.mrf.mxu1 }
 0x380   :  { %v397_v44 = vrot.slane %v392_v43, 6  ;;  %v298_v45 = vpop.f32.mrf.mxu0 }
 0x381   :  { %v299_v46 = vadd.f32 %v2946_v42, %v298_v45  ;;  %v2345_v47 = vpop.f32.mrf.mxu1 }
 0x382   :  { %v399_v48 = vadd.f32 %v397_v44, %v2846_v16  ;;  %v2334_v49 = vpop.f32.mrf.mxu0 }
 0x383   :  { %2597 = vtanh.f32 %v299_v46  ;;  %v302_v52 = vmul.f32 0.5, %v299_v46 }
 0x384   :  { %2599 = vtanh.f32 %v399_v48  ;;  %v400_v53 = vmul.f32 0.5, %v399_v48 }
 0x385   :  { %2601 = vtanh.f32 %v302_v52 }
 0x386   :  { %2603 = vtanh.f32 %v400_v53 }
 0x390   :  { %v2598_v50 = vpop.eup %2597 }
 0x391   :  { %v2600_v51 = vpop.eup %2599  ;;  %309 = vrot.lane.b32.xlu0 %v2598_v50, %s2744_s10 }
 0x392   :  { %410 = vrot.lane.b32.xlu1 %v2600_v51, %s2744_s10  ;;  %v2602_v54 = vpop.eup %2601 }
 0x393   :  { %v2604_v55 = vpop.eup %2603  ;;  %v304_v56 = vadd.f32 1.0, %v2602_v54 }
 0x394   :  { %v402_v57 = vadd.f32 1.0, %v2604_v55 }
 0x395   :  { %v305_v58 = vmul.f32 0.5, %v304_v56 }
 0x396   :  { %v403_v60 = vmul.f32 0.5, %v402_v57 }
 0x397   :  { %v307_v1 = vmul.f32 0.0, %v305_v58 }
 0x398   :  { %v408_v6 = vmul.f32 %v406_v0, %v403_v60 }
 0x403   :  { %v310_v59 = vpop.permute.xlu0 %309 }
 0x404   :  { %v312_v61 = vmul.f32 %v310_v59, %v305_v58  ;;  %v411_v62 = vpop.permute.xlu1 %410 }
 0x405   :  { %v413_v63 = vmul.f32 %v411_v62, %v403_v60 }
 0x406   :  { %314 = vrot.lane.b32.xlu0 %v312_v61, %s2745_s11 }
 0x407   :  { %415 = vrot.lane.b32.xlu1 %v413_v63, %s2745_s11 }
 0x478   :  { %v315_v5 = vpop.permute.xlu0 %314 }
 0x479   :  { %v2955_v7 = vadd.f32 %v315_v5, %v307_v1  ;;  %v416_v9 = vpop.permute.xlu1 %415 }
 0x47a   :  { %v2957_v11 = vadd.f32 %v416_v9, %v408_v6 }
 0x47b   :  { %2605 = vtanh.f32 %v2955_v7 }
 0x47c   :  { %2607 = vtanh.f32 %v2957_v11 }
 0x488   :  { %v2606_v12 = vpop.eup %2605 }
 0x489   :  { %v2608_v14 = vpop.eup %2607  ;;  %320 = vrot.lane.b32.xlu0 %v2606_v12, %s2744_s10 }
 0x48a   :  { %421 = vrot.lane.b32.xlu1 %v2608_v14, %s2744_s10 }
 0x4fb   :  { %v321_v15 = vpop.permute.xlu0 %320 }
 0x4fc   :  { %v323_v17 = vmul.f32 %v321_v15, %v305_v58  ;;  %v422_v18 = vpop.permute.xlu1 %421  ;;  %v616_v58 = vrot.slane %v2957_v11, 6 }
 0x4fd   :  { %v424_v19 = vmul.f32 %v422_v18, %v403_v60 }
 0x4fe   :  { %v430_v20 = vrot.slane %v323_v17, 6 }
 0x4ff   :  { %426 = vrot.lane.b32.xlu0 %v424_v19, %s2745_s11  ;;  %v531_v21 = vrot.slane %v424_v19, 2 }
 0x500   :  { %431 = vrot.lane.b32.xlu1 %v430_v20, %s2744_s10 }
 0x503   :  { %532 = vrot.lane.b32.xlu0 %v531_v21, %s2745_s11 }
 0x571   :  { %v427_v22 = vpop.permute.xlu0 %426 }
 0x572   :  { %v432_v23 = vpop.permute.xlu1 %431 }
 0x573   :  { %v434_v24 = vsel %vm41_vm0, %v427_v22, %v432_v23 }
 0x574   :  { %v436_v25 = vrot.slane %v434_v24, 2 }
 0x575   :  { %v533_v26 = vpop.permute.xlu0 %532 }
 0x576   :  { %2363 = vmatmul.mubr.msk.f32.vlgmr.msra.gmra.mxu1 %vm228_vm2, %v436_v25  ;;  %2374 = vmatmul.mubr.msk.f32.vlgmr.msra.gmra.mxu0 %vm41_vm0, %v533_v26 }
 0x577   :  { %2377 = vmatpush3.msra.mxu0 %v2857_v29  ;;  %2396 = vmatpush3.msra.mxu1 %v2785_v2 }
 0x578   :  { %2378 = vmatprep.subr.mxu0 %v2742_v3  ;;  %2397 = vmatprep.subr.mxu1 %v2742_v3 }
 0x579   :  { %2379 = vmatpush3.msra.mxu0 %v2862_v30  ;;  %2398 = vmatpush3.msra.mxu1 %v2791_v4 }
 0x57a   :  { %2380 = vmatprep.subr.mxu0 %v2742_v3  ;;  %2399 = vmatprep.subr.mxu1 %v2742_v3 }
 0x57b   :  { %2381 = vmatpush3.msra.mxu0 %v2869_v31  ;;  %2400 = vmatpush3.msra.mxu1 %v2808_v8 }
 0x57c   :  { %2382 = vmatprep.subr.mxu0 %v2742_v3  ;;  %2392 = vmatprep.mubr.msk.f32.mxu0 %vm2743_vm1, %v2742_v3 }
 0x57d   :  { %2383 = vmatpush3.msra.mxu0 %v2876_v32  ;;  %2401 = vmatprep.subr.mxu1 %v2742_v3 }
 0x57e   :  { %2384 = vmatprep.subr.mxu0 %v2742_v3  ;;  %2402 = vmatpush3.msra.mxu1 %v2818_v10 }
 0x57f   :  { %2385 = vmatpush3.msra.mxu0 %v2883_v33  ;;  %2403 = vmatprep.mubr.msk.f32.mxu1 %vm2743_vm1, %v2742_v3 }
 0x580   :  { %2386 = vmatprep.subr.mxu0 %v2742_v3  ;;  %2406 = vmatprep.subr.mxu1 %v2742_v3 }
 0x581   :  { %2387 = vmatpush3.msra.mxu0 %v2890_v34 }
 0x582   :  { %2388 = vmatprep.subr.mxu0 %v2742_v3 }
 0x583   :  { %2389 = vmatpush3.msra.mxu0 %v2897_v36 }
 0x584   :  { %2390 = vmatprep.subr.mxu0 %v2742_v3 }
 0x585   :  { %2391 = vmatpush3.msra.mxu0 %v2907_v37 }
 0x586   :  { %2425 = vmatprep.subr.mxu0 %v2742_v3 }
 0x636   :  { %v505_v27 = vpop.f32.mrf.mxu1  ;;  %v602_v28 = vpop.f32.mrf.mxu0 }
 0x637   :  { %v506_v35 = vadd.f32 %v2946_v42, %v505_v27  ;;  %v607_v38 = vrot.slane %v602_v28, 4 }
 0x638   :  { %v2364_v39 = vpop.f32.mrf.mxu1  ;;  %v2375_v40 = vpop.f32.mrf.mxu0 }
 0x639   :  { %2609 = vtanh.f32 %v506_v35  ;;  %v609_v41 = vadd.f32 %v607_v38, %v2846_v16  ;;  %v509_v45 = vmul.f32 0.5, %v506_v35 }
 0x63b   :  { %2611 = vtanh.f32 %v609_v41  ;;  %v610_v46 = vmul.f32 0.5, %v609_v41 }
 0x63c   :  { %2613 = vtanh.f32 %v509_v45 }
 0x63d   :  { %2615 = vtanh.f32 %v610_v46 }
 0x646   :  { %v2610_v43 = vpop.eup %2609 }
 0x647   :  { %516 = vrot.lane.b32.xlu1 %v2610_v43, %s2744_s10 }
 0x648   :  { %v2612_v44 = vpop.eup %2611 }
 0x649   :  { %620 = vrot.lane.b32.xlu0 %v2612_v44, %s2744_s10  ;;  %v2614_v47 = vpop.eup %2613 }
 0x64a   :  { %v2616_v48 = vpop.eup %2615  ;;  %v511_v49 = vadd.f32 1.0, %v2614_v47 }
 0x64b   :  { %v612_v50 = vadd.f32 1.0, %v2616_v48 }
 0x64c   :  { %v512_v51 = vmul.f32 0.5, %v511_v49 }
 0x64d   :  { %v613_v54 = vmul.f32 0.5, %v612_v50 }
 0x64e   :  { %v514_v57 = vmul.f32 %v512_v51, %v2955_v7 }
 0x64f   :  { %v618_v61 = vmul.f32 %v616_v58, %v613_v54 }
 0x6b9   :  { %v517_v52 = vpop.permute.xlu1 %516 }
 0x6ba   :  { %v519_v53 = vmul.f32 %v517_v52, %v512_v51 }
 0x6bb   :  { %v621_v55 = vpop.permute.xlu0 %620 }
 0x6bc   :  { %521 = vrot.lane.b32.xlu1 %v519_v53, %s2745_s11  ;;  %v623_v56 = vmul.f32 %v621_v55, %v613_v54 }
 0x6be   :  { %625 = vrot.lane.b32.xlu0 %v623_v56, %s2745_s11 }
 0x72e   :  { %v522_v59 = vpop.permute.xlu1 %521 }
 0x72f   :  { %v3005_v60 = vadd.f32 %v522_v59, %v514_v57 }
 0x730   :  { %v626_v62 = vpop.permute.xlu0 %625 }
 0x731   :  { %2617 = vtanh.f32 %v3005_v60  ;;  %v3008_v63 = vadd.f32 %v626_v62, %v618_v61 }
 0x733   :  { %2619 = vtanh.f32 %v3008_v63  ;;  %v826_v50 = vrot.slane %v3008_v63, 6 }
 0x73e   :  { %v2618_v0 = vpop.eup %2617 }
 0x73f   :  { %527 = vrot.lane.b32.xlu1 %v2618_v0, %s2744_s10 }
 0x740   :  { %v2620_v1 = vpop.eup %2619 }
 0x741   :  { %631 = vrot.lane.b32.xlu0 %v2620_v1, %s2744_s10 }
 0x7b1   :  { %v528_v5 = vpop.permute.xlu1 %527 }
 0x7b2   :  { %v530_v6 = vmul.f32 %v528_v5, %v512_v51 }
 0x7b3   :  { %v632_v9 = vpop.permute.xlu0 %631 }
 0x7b4   :  { %v640_v7 = vrot.slane %v530_v6, 4  ;;  %v634_v11 = vmul.f32 %v632_v9, %v613_v54 }
 0x7b6   :  { %641 = vrot.lane.b32.xlu0 %v640_v7, %s2744_s10  ;;  %636 = vrot.lane.b32.xlu1 %v634_v11, %s2745_s11  ;;  %v741_v12 = vrot.slane %v634_v11, 4 }
 0x7ba   :  { %742 = vrot.lane.b32.xlu1 %v741_v12, %s2745_s11 }
 0x828   :  { %v642_v14 = vpop.permute.xlu0 %641  ;;  %v637_v15 = vpop.permute.xlu1 %636 }
 0x829   :  { %v644_v17 = vsel %vm41_vm0, %v637_v15, %v642_v14 }
 0x82a   :  { %v646_v18 = vrot.slane %v644_v17, 4 }
 0x82c   :  { %v743_v19 = vpop.permute.xlu1 %742  ;;  %2393 = vmatmul.mubr.msk.f32.vlgmr.msra.gmra.mxu0 %vm228_vm2, %v646_v18 }
 0x82d   :  { %2404 = vmatmul.mubr.msk.f32.vlgmr.msra.gmra.mxu1 %vm41_vm0, %v743_v19  ;;  %2426 = vmatpush3.msra.mxu0 %v2785_v2 }
 0x82e   :  { %2407 = vmatpush3.msra.mxu1 %v2857_v29  ;;  %2427 = vmatprep.subr.mxu0 %v2742_v3 }
 0x82f   :  { %2408 = vmatprep.subr.mxu1 %v2742_v3  ;;  %2428 = vmatpush3.msra.mxu0 %v2791_v4 }
 0x830   :  { %2409 = vmatpush3.msra.mxu1 %v2862_v30  ;;  %2429 = vmatprep.subr.mxu0 %v2742_v3 }
 0x831   :  { %2410 = vmatprep.subr.mxu1 %v2742_v3  ;;  %2430 = vmatpush3.msra.mxu0 %v2808_v8 }
 0x832   :  { %2411 = vmatpush3.msra.mxu1 %v2869_v31  ;;  %2422 = vmatprep.mubr.msk.f32.mxu1 %vm2743_vm1, %v2742_v3 }
 0x833   :  { %2412 = vmatprep.subr.mxu1 %v2742_v3  ;;  %2431 = vmatprep.subr.mxu0 %v2742_v3 }
 0x834   :  { %2413 = vmatpush3.msra.mxu1 %v2876_v32  ;;  %2432 = vmatpush3.msra.mxu0 %v2818_v10 }
 0x835   :  { %2414 = vmatprep.subr.mxu1 %v2742_v3  ;;  %2433 = vmatprep.mubr.msk.f32.mxu0 %vm2743_vm1, %v2742_v3 }
 0x836   :  { %2415 = vmatpush3.msra.mxu1 %v2883_v33  ;;  %2436 = vmatprep.subr.mxu0 %v2742_v3 }
 0x837   :  { %2416 = vmatprep.subr.mxu1 %v2742_v3 }
 0x838   :  { %2417 = vmatpush3.msra.mxu1 %v2890_v34 }
 0x839   :  { %2418 = vmatprep.subr.mxu1 %v2742_v3 }
 0x83a   :  { %2419 = vmatpush3.msra.mxu1 %v2897_v36 }
 0x83b   :  { %2420 = vmatprep.subr.mxu1 %v2742_v3 }
 0x83c   :  { %2421 = vmatpush3.msra.mxu1 %v2907_v37 }
 0x83d   :  { %2455 = vmatprep.subr.mxu1 %v2742_v3 }
 0x8ec   :  { %v715_v20 = vpop.f32.mrf.mxu0 }
 0x8ed   :  { %v716_v21 = vadd.f32 %v2946_v42, %v715_v20  ;;  %v812_v22 = vpop.f32.mrf.mxu1 }
 0x8ee   :  { %v817_v23 = vrot.slane %v812_v22, 2  ;;  %v2394_v24 = vpop.f32.mrf.mxu0 }
 0x8ef   :  { %2621 = vtanh.f32 %v716_v21  ;;  %v2405_v25 = vpop.f32.mrf.mxu1  ;;  %v719_v35 = vmul.f32 0.5, %v716_v21 }
 0x8f0   :  { %v819_v26 = vadd.f32 %v817_v23, %v2846_v16 }
 0x8f2   :  { %2623 = vtanh.f32 %v819_v26  ;;  %v820_v38 = vmul.f32 0.5, %v819_v26 }
 0x8f3   :  { %2625 = vtanh.f32 %v719_v35 }
 0x8f4   :  { %2627 = vtanh.f32 %v820_v38 }
 0x8fc   :  { %v2622_v27 = vpop.eup %2621 }
 0x8fd   :  { %726 = vrot.lane.b32.xlu0 %v2622_v27, %s2744_s10 }
 0x8ff   :  { %v2624_v28 = vpop.eup %2623 }
 0x900   :  { %830 = vrot.lane.b32.xlu1 %v2624_v28, %s2744_s10  ;;  %v2626_v39 = vpop.eup %2625 }
 0x901   :  { %v2628_v40 = vpop.eup %2627  ;;  %v721_v41 = vadd.f32 1.0, %v2626_v39 }
 0x902   :  { %v822_v43 = vadd.f32 1.0, %v2628_v40 }
 0x903   :  { %v722_v44 = vmul.f32 0.5, %v721_v41 }
 0x904   :  { %v823_v47 = vmul.f32 0.5, %v822_v43 }
 0x905   :  { %v724_v49 = vmul.f32 %v722_v44, %v3005_v60 }
 0x906   :  { %v828_v53 = vmul.f32 %v826_v50, %v823_v47 }
 0x96f   :  { %v727_v45 = vpop.permute.xlu0 %726 }
 0x970   :  { %v729_v46 = vmul.f32 %v727_v45, %v722_v44 }
 0x972   :  { %v831_v16 = vpop.permute.xlu1 %830  ;;  %731 = vrot.lane.b32.xlu0 %v729_v46, %s2745_s11 }
 0x973   :  { %v833_v48 = vmul.f32 %v831_v16, %v823_v47 }
 0x975   :  { %835 = vrot.lane.b32.xlu1 %v833_v48, %s2745_s11 }
 0x9e4   :  { %v732_v51 = vpop.permute.xlu0 %731 }
 0x9e5   :  { %v3055_v52 = vadd.f32 %v732_v51, %v724_v49 }
 0x9e7   :  { %2629 = vtanh.f32 %v3055_v52  ;;  %v836_v54 = vpop.permute.xlu1 %835 }
 0x9e8   :  { %v3058_v55 = vadd.f32 %v836_v54, %v828_v53 }
 0x9ea   :  { %2631 = vtanh.f32 %v3058_v55  ;;  %v1033_v40 = vrot.slane %v3058_v55, 6 }
 0x9f4   :  { %v2630_v56 = vpop.eup %2629 }
 0x9f5   :  { %737 = vrot.lane.b32.xlu0 %v2630_v56, %s2744_s10 }
 0x9f7   :  { %v2632_v57 = vpop.eup %2631 }
 0x9f8   :  { %841 = vrot.lane.b32.xlu1 %v2632_v57, %s2744_s10 }
 0xa67   :  { %v738_v58 = vpop.permute.xlu0 %737 }
 0xa68   :  { %v740_v59 = vmul.f32 %v738_v58, %v722_v44 }
 0xa6a   :  { %v850_v60 = vrot.slane %v740_v59, 2  ;;  %v842_v61 = vpop.permute.xlu1 %841 }
 0xa6b   :  { %v844_v62 = vmul.f32 %v842_v61, %v823_v47 }
 0xa6c   :  { %851 = vrot.lane.b32.xlu1 %v850_v60, %s2744_s10 }
 0xa6d   :  { %846 = vrot.lane.b32.xlu0 %v844_v62, %s2745_s11  ;;  %v951_v63 = vrot.slane %v844_v62, 6 }
 0xa71   :  { %952 = vrot.lane.b32.xlu0 %v951_v63, %s2745_s11 }
 0xade   :  { %v852_v0 = vpop.permute.xlu1 %851 }
 0xadf   :  { %v847_v1 = vpop.permute.xlu0 %846 }
 0xae0   :  { %v854_v5 = vsel %vm41_vm0, %v847_v1, %v852_v0 }
 0xae1   :  { %v856_v6 = vrot.slane %v854_v5, 6 }
 0xae3   :  { %2423 = vmatmul.mubr.msk.f32.vlgmr.msra.gmra.mxu1 %vm228_vm2, %v856_v6  ;;  %v953_v7 = vpop.permute.xlu0 %952 }
 0xae4   :  { %2434 = vmatmul.mubr.msk.f32.vlgmr.msra.gmra.mxu0 %vm41_vm0, %v953_v7  ;;  %2456 = vmatpush3.msra.mxu1 %v2785_v2 }
 0xae5   :  { %2437 = vmatpush3.msra.mxu0 %v2857_v29  ;;  %2457 = vmatprep.subr.mxu1 %v2742_v3 }
 0xae6   :  { %2438 = vmatprep.subr.mxu0 %v2742_v3  ;;  %2458 = vmatpush3.msra.mxu1 %v2791_v4 }
 0xae7   :  { %2439 = vmatpush3.msra.mxu0 %v2862_v30  ;;  %2459 = vmatprep.subr.mxu1 %v2742_v3 }
 0xae8   :  { %2440 = vmatprep.subr.mxu0 %v2742_v3  ;;  %2460 = vmatpush3.msra.mxu1 %v2808_v8 }
 0xae9   :  { %2441 = vmatpush3.msra.mxu0 %v2869_v31  ;;  %2461 = vmatprep.subr.mxu1 %v2742_v3 }
 0xaea   :  { %2442 = vmatprep.subr.mxu0 %v2742_v3  ;;  %2462 = vmatpush3.msra.mxu1 %v2818_v10 }
 0xaeb   :  { %2443 = vmatpush3.msra.mxu0 %v2876_v32  ;;  %2463 = vmatprep.mubr.msk.f32.mxu1 %vm2743_vm1, %v2742_v3 }
 0xaec   :  { %2444 = vmatprep.subr.mxu0 %v2742_v3  ;;  %2452 = vmatprep.mubr.msk.f32.mxu0 %vm2743_vm1, %v2742_v3 }
 0xaed   :  { %2445 = vmatpush3.msra.mxu0 %v2883_v33  ;;  %2466 = vmatprep.subr.mxu1 %v2742_v3 }
 0xaee   :  { %2446 = vmatprep.subr.mxu0 %v2742_v3 }
 0xaef   :  { %2447 = vmatpush3.msra.mxu0 %v2890_v34 }
 0xaf0   :  { %2448 = vmatprep.subr.mxu0 %v2742_v3 }
 0xaf1   :  { %2449 = vmatpush3.msra.mxu0 %v2897_v36 }
 0xaf2   :  { %2450 = vmatprep.subr.mxu0 %v2742_v3 }
 0xaf3   :  { %2451 = vmatpush3.msra.mxu0 %v2907_v37 }
 0xaf4   :  { %2485 = vmatprep.subr.mxu0 %v2742_v3 }
 0xba3   :  { %v925_v9 = vpop.f32.mrf.mxu1 }
 0xba4   :  { %v926_v11 = vadd.f32 %v2946_v42, %v925_v9  ;;  %v1022_v12 = vpop.f32.mrf.mxu0 }
 0xba5   :  { %v1026_v14 = vadd.f32 %v1022_v12, %v2844_v13  ;;  %v2424_v15 = vpop.f32.mrf.mxu1 }
 0xba6   :  { %2633 = vtanh.f32 %v926_v11  ;;  %v2435_v17 = vpop.f32.mrf.mxu0  ;;  %v929_v20 = vmul.f32 0.5, %v926_v11 }
 0xba7   :  { %2635 = vtanh.f32 %v1026_v14  ;;  %v1027_v21 = vmul.f32 0.5, %v1026_v14 }
 0xba8   :  { %2637 = vtanh.f32 %v929_v20 }
 0xba9   :  { %2639 = vtanh.f32 %v1027_v21 }
 0xbb3   :  { %v2634_v18 = vpop.eup %2633 }
 0xbb4   :  { %v2636_v19 = vpop.eup %2635  ;;  %936 = vrot.lane.b32.xlu1 %v2634_v18, %s2744_s10 }
 0xbb5   :  { %1037 = vrot.lane.b32.xlu0 %v2636_v19, %s2744_s10  ;;  %v2638_v22 = vpop.eup %2637 }
 0xbb6   :  { %v2640_v23 = vpop.eup %2639  ;;  %v931_v24 = vadd.f32 1.0, %v2638_v22 }
 0xbb7   :  { %v1029_v25 = vadd.f32 1.0, %v2640_v23 }
 0xbb8   :  { %v932_v26 = vmul.f32 0.5, %v931_v24 }
 0xbb9   :  { %v1030_v28 = vmul.f32 0.5, %v1029_v25 }
 0xbba   :  { %v934_v41 = vmul.f32 %v932_v26, %v3055_v52 }
 0xbbb   :  { %v1035_v44 = vmul.f32 %v1033_v40, %v1030_v28 }
 0xc26   :  { %v937_v27 = vpop.permute.xlu1 %936 }
 0xc27   :  { %v939_v35 = vmul.f32 %v937_v27, %v932_v26  ;;  %v1038_v38 = vpop.permute.xlu0 %1037 }
 0xc28   :  { %v1040_v39 = vmul.f32 %v1038_v38, %v1030_v28 }
 0xc29   :  { %941 = vrot.lane.b32.xlu1 %v939_v35, %s2745_s11 }
 0xc2a   :  { %1042 = vrot.lane.b32.xlu0 %v1040_v39, %s2745_s11 }
 0xc9b   :  { %v942_v43 = vpop.permute.xlu1 %941 }
 0xc9c   :  { %v3105_v45 = vadd.f32 %v942_v43, %v934_v41  ;;  %v1043_v46 = vpop.permute.xlu0 %1042 }
 0xc9d   :  { %v3107_v47 = vadd.f32 %v1043_v46, %v1035_v44 }
 0xc9e   :  { %2641 = vtanh.f32 %v3105_v45 }
 0xc9f   :  { %2643 = vtanh.f32 %v3107_v47  ;;  %v1238_v18 = vrot.slane %v3107_v47, 6  ;;  %v2709_v47 = vld [vmem:[%s3367_s0 + $0x38] sm:$0xff] }
 0xcab   :  { %v2642_v16 = vpop.eup %2641 }
 0xcac   :  { %v2644_v48 = vpop.eup %2643  ;;  %947 = vrot.lane.b32.xlu1 %v2642_v16, %s2744_s10  ;;  %v2710_v16 = vld [vmem:[%s3367_s0 + $0x30] sm:$0xff] }
 0xcad   :  { %1048 = vrot.lane.b32.xlu0 %v2644_v48, %s2744_s10 }
 0xd1e   :  { %v948_v49 = vpop.permute.xlu1 %947 }
 0xd1f   :  { %v950_v50 = vmul.f32 %v948_v49, %v932_v26  ;;  %v1049_v51 = vpop.permute.xlu0 %1048 }
 0xd20   :  { %v1051_v52 = vmul.f32 %v1049_v51, %v1030_v28 }
 0xd21   :  { %1057 = vrot.lane.b32.xlu0 %v950_v50, %s2744_s10 }
 0xd22   :  { %1053 = vrot.lane.b32.xlu1 %v1051_v52, %s2745_s11 }
 0xd93   :  { %v1058_v53 = vpop.permute.xlu0 %1057 }
 0xd94   :  { %v1054_v54 = vpop.permute.xlu1 %1053 }
 0xd95   :  { %v1060_v55 = vsel %vm41_vm0, %v1054_v54, %v1058_v53  ;;  %2464 = vmatmul.mubr.msk.f32.vlgmr.msra.gmra.mxu1 %vm41_vm0, %v1054_v54 }
 0xd96   :  { %2453 = vmatmul.mubr.msk.f32.vlgmr.msra.gmra.mxu0 %vm228_vm2, %v1060_v55  ;;  %2467 = vmatpush3.msra.mxu1 %v2857_v29 }
 0xd97   :  { %2468 = vmatprep.subr.mxu1 %v2742_v3  ;;  %2486 = vmatpush3.msra.mxu0 %v2785_v2 }
 0xd98   :  { %2469 = vmatpush3.msra.mxu1 %v2862_v30  ;;  %2487 = vmatprep.subr.mxu0 %v2742_v3 }
 0xd99   :  { %2470 = vmatprep.subr.mxu1 %v2742_v3  ;;  %2488 = vmatpush3.msra.mxu0 %v2791_v4 }
 0xd9a   :  { %2471 = vmatpush3.msra.mxu1 %v2869_v31  ;;  %2489 = vmatprep.subr.mxu0 %v2742_v3 }
 0xd9b   :  { %2472 = vmatprep.subr.mxu1 %v2742_v3  ;;  %2490 = vmatpush3.msra.mxu0 %v2808_v8 }
 0xd9c   :  { %2473 = vmatpush3.msra.mxu1 %v2876_v32  ;;  %2491 = vmatprep.subr.mxu0 %v2742_v3 }
 0xd9d   :  { %2474 = vmatprep.subr.mxu1 %v2742_v3  ;;  %2482 = vmatprep.mubr.msk.f32.mxu1 %vm2743_vm1, %v2742_v3 }
 0xd9e   :  { %2475 = vmatpush3.msra.mxu1 %v2883_v33  ;;  %2492 = vmatpush3.msra.mxu0 %v2818_v10 }
 0xd9f   :  { %2476 = vmatprep.subr.mxu1 %v2742_v3  ;;  %2493 = vmatprep.mubr.msk.f32.mxu0 %vm2743_vm1, %v2742_v3 }
 0xda0   :  { %2477 = vmatpush3.msra.mxu1 %v2890_v34  ;;  %2496 = vmatprep.subr.mxu0 %v2742_v3 }
 0xda1   :  { %2478 = vmatprep.subr.mxu1 %v2742_v3 }
 0xda2   :  { %2479 = vmatpush3.msra.mxu1 %v2897_v36 }
 0xda3   :  { %2480 = vmatprep.subr.mxu1 %v2742_v3 }
 0xda4   :  { %2481 = vmatpush3.msra.mxu1 %v2907_v37 }
 0xda5   :  { %2515 = vmatprep.subr.mxu1 %v2742_v3 }
 0xe55   :  { %v1224_v2 = vpop.f32.mrf.mxu1 }
 0xe56   :  { %v1229_v4 = vrot.slane %v1224_v2, 6  ;;  %v1130_v56 = vpop.f32.mrf.mxu0 }
 0xe57   :  { %v1131_v57 = vadd.f32 %v2946_v42, %v1130_v56  ;;  %v2465_v58 = vpop.f32.mrf.mxu1 }
 0xe58   :  { %v1231_v59 = vadd.f32 %v1229_v4, %v2844_v13  ;;  %v2454_v60 = vpop.f32.mrf.mxu0 }
 0xe59   :  { %2645 = vtanh.f32 %v1131_v57  ;;  %v1134_v63 = vmul.f32 0.5, %v1131_v57 }
 0xe5a   :  { %2647 = vtanh.f32 %v1231_v59  ;;  %v1232_v0 = vmul.f32 0.5, %v1231_v59 }
 0xe5b   :  { %2649 = vtanh.f32 %v1134_v63 }
 0xe5c   :  { %2651 = vtanh.f32 %v1232_v0 }
 0xe66   :  { %v2646_v61 = vpop.eup %2645 }
 0xe67   :  { %v2648_v62 = vpop.eup %2647  ;;  %1141 = vrot.lane.b32.xlu1 %v2646_v61, %s2744_s10 }
 0xe68   :  { %1242 = vrot.lane.b32.xlu0 %v2648_v62, %s2744_s10  ;;  %v2650_v1 = vpop.eup %2649 }
 0xe69   :  { %v2652_v5 = vpop.eup %2651  ;;  %v1136_v6 = vadd.f32 1.0, %v2650_v1 }
 0xe6a   :  { %v1234_v7 = vadd.f32 1.0, %v2652_v5 }
 0xe6b   :  { %v1137_v9 = vmul.f32 0.5, %v1136_v6 }
 0xe6c   :  { %v1235_v12 = vmul.f32 0.5, %v1234_v7 }
 0xe6d   :  { %v1139_v19 = vmul.f32 %v1137_v9, %v3105_v45 }
 0xe6e   :  { %v1240_v21 = vmul.f32 %v1238_v18, %v1235_v12 }
 0xed9   :  { %v1142_v11 = vpop.permute.xlu1 %1141 }
 0xeda   :  { %v1144_v14 = vmul.f32 %v1142_v11, %v1137_v9  ;;  %v1243_v15 = vpop.permute.xlu0 %1242 }
 0xedb   :  { %v1245_v17 = vmul.f32 %v1243_v15, %v1235_v12 }
 0xedc   :  { %1146 = vrot.lane.b32.xlu1 %v1144_v14, %s2745_s11 }
 0xedd   :  { %1247 = vrot.lane.b32.xlu0 %v1245_v17, %s2745_s11 }
 0xf4e   :  { %v1147_v20 = vpop.permute.xlu1 %1146 }
 0xf4f   :  { %v3154_v22 = vadd.f32 %v1147_v20, %v1139_v19  ;;  %v1248_v23 = vpop.permute.xlu0 %1247  ;;  %v2711_v20 = vld [vmem:[%s3367_s0 + $0x80] sm:$0xff] }
 0xf50   :  { %v3156_v24 = vadd.f32 %v1248_v23, %v1240_v21  ;;  %v2712_v21 = vld [vmem:[%s3367_s0 + $0x78] sm:$0xff]  ;;  %v2714_v23 = vld [vmem:[%s3367_s0 + $0x68] sm:$0xff] }
 0xf51   :  { %2653 = vtanh.f32 %v3154_v22 }
 0xf52   :  { %2655 = vtanh.f32 %v3156_v24  ;;  %v1448_v58 = vrot.slane %v3156_v24, 6  ;;  %v2715_v24 = vld [vmem:[%s3367_s0 + $0x60] sm:$0xff] }
 0xf5e   :  { %v2654_v25 = vpop.eup %2653 }
 0xf5f   :  { %v2656_v26 = vpop.eup %2655  ;;  %1152 = vrot.lane.b32.xlu1 %v2654_v25, %s2744_s10  ;;  %v2716_v25 = vld [vmem:[%s3367_s0 + $0x58] sm:$0xff] }
 0xf60   :  { %1253 = vrot.lane.b32.xlu0 %v2656_v26, %s2744_s10  ;;  %v2717_v26 = vld [vmem:[%s3367_s0 + $0x50] sm:$0xff] }
 0xfd1   :  { %v1153_v27 = vpop.permute.xlu1 %1152 }
 0xfd2   :  { %v1155_v28 = vmul.f32 %v1153_v27, %v1137_v9  ;;  %v1254_v35 = vpop.permute.xlu0 %1253  ;;  %v2718_v27 = vld [vmem:[%s3367_s0 + $0x48] sm:$0xff] }
 0xfd3   :  { %v1256_v38 = vmul.f32 %v1254_v35, %v1235_v12 }
 0xfd4   :  { %v1262_v39 = vrot.slane %v1155_v28, 6 }
 0xfd5   :  { %1258 = vrot.lane.b32.xlu1 %v1256_v38, %s2745_s11  ;;  %v1363_v40 = vrot.slane %v1256_v38, 2 }
 0xfd6   :  { %1263 = vrot.lane.b32.xlu0 %v1262_v39, %s2744_s10 }
 0xfd9   :  { %1364 = vrot.lane.b32.xlu1 %v1363_v40, %s2745_s11 }
0x1047   :  { %v1259_v41 = vpop.permute.xlu1 %1258 }
0x1048   :  { %v1264_v43 = vpop.permute.xlu0 %1263 }
0x1049   :  { %v1266_v44 = vsel %vm41_vm0, %v1259_v41, %v1264_v43 }
0x104a   :  { %v1268_v45 = vrot.slane %v1266_v44, 2 }
0x104b   :  { %v1365_v46 = vpop.permute.xlu1 %1364 }
0x104c   :  { %2483 = vmatmul.mubr.msk.f32.vlgmr.msra.gmra.mxu1 %vm228_vm2, %v1268_v45  ;;  %2494 = vmatmul.mubr.msk.f32.vlgmr.msra.gmra.mxu0 %vm41_vm0, %v1365_v46 }
0x104d   :  { %2497 = vmatpush3.msra.mxu0 %v2857_v29  ;;  %2516 = vmatpush3.msra.mxu1 %v2709_v47 }
0x104e   :  { %2498 = vmatprep.subr.mxu0 %v2742_v3  ;;  %2517 = vmatprep.subr.mxu1 %v2742_v3 }
0x104f   :  { %2499 = vmatpush3.msra.mxu0 %v2862_v30  ;;  %2518 = vmatpush3.msra.mxu1 %v2710_v16 }
0x1050   :  { %2500 = vmatprep.subr.mxu0 %v2742_v3  ;;  %2519 = vmatprep.subr.mxu1 %v2742_v3 }
0x1051   :  { %2501 = vmatpush3.msra.mxu0 %v2869_v31  ;;  %2520 = vmatpush3.msra.mxu1 %v2808_v8 }
0x1052   :  { %2502 = vmatprep.subr.mxu0 %v2742_v3  ;;  %2512 = vmatprep.mubr.msk.f32.mxu0 %vm2743_vm1, %v2742_v3 }
0x1053   :  { %2503 = vmatpush3.msra.mxu0 %v2876_v32  ;;  %2521 = vmatprep.subr.mxu1 %v2742_v3 }
0x1054   :  { %2504 = vmatprep.subr.mxu0 %v2742_v3  ;;  %2522 = vmatpush3.msra.mxu1 %v2818_v10 }
0x1055   :  { %2505 = vmatpush3.msra.mxu0 %v2883_v33  ;;  %2523 = vmatprep.mubr.msk.f32.mxu1 %vm2743_vm1, %v2742_v3 }
0x1056   :  { %2506 = vmatprep.subr.mxu0 %v2742_v3  ;;  %2526 = vmatprep.subr.mxu1 %v2742_v3 }
0x1057   :  { %2507 = vmatpush3.msra.mxu0 %v2890_v34 }
0x1058   :  { %2508 = vmatprep.subr.mxu0 %v2742_v3 }
0x1059   :  { %2509 = vmatpush3.msra.mxu0 %v2897_v36 }
0x105a   :  { %2510 = vmatprep.subr.mxu0 %v2742_v3 }
0x105b   :  { %2511 = vmatpush3.msra.mxu0 %v2907_v37 }
0x105c   :  { %2545 = vmatprep.subr.mxu0 %v2742_v3 }
0x110c   :  { %v1337_v8 = vpop.f32.mrf.mxu1  ;;  %v1434_v10 = vpop.f32.mrf.mxu0 }
0x110d   :  { %v1338_v29 = vadd.f32 %v2946_v42, %v1337_v8  ;;  %v1439_v30 = vrot.slane %v1434_v10, 4 }
0x110e   :  { %v2484_v31 = vpop.f32.mrf.mxu1  ;;  %v2495_v32 = vpop.f32.mrf.mxu0 }
0x110f   :  { %2657 = vtanh.f32 %v1338_v29  ;;  %v1441_v33 = vadd.f32 %v1439_v30, %v2844_v13  ;;  %v1341_v37 = vmul.f32 0.5, %v1338_v29 }
0x1111   :  { %2659 = vtanh.f32 %v1441_v33  ;;  %v1442_v48 = vmul.f32 0.5, %v1441_v33 }
0x1112   :  { %2661 = vtanh.f32 %v1341_v37 }
0x1113   :  { %2663 = vtanh.f32 %v1442_v48 }
0x111c   :  { %v2658_v34 = vpop.eup %2657 }
0x111d   :  { %1348 = vrot.lane.b32.xlu0 %v2658_v34, %s2744_s10 }
0x111e   :  { %v2660_v36 = vpop.eup %2659 }
0x111f   :  { %1452 = vrot.lane.b32.xlu1 %v2660_v36, %s2744_s10  ;;  %v2662_v49 = vpop.eup %2661 }
0x1120   :  { %v2664_v50 = vpop.eup %2663  ;;  %v1343_v51 = vadd.f32 1.0, %v2662_v49 }
0x1121   :  { %v1444_v52 = vadd.f32 1.0, %v2664_v50 }
0x1122   :  { %v1344_v53 = vmul.f32 0.5, %v1343_v51 }
0x1123   :  { %v1445_v2 = vmul.f32 0.5, %v1444_v52 }
0x1124   :  { %v1346_v57 = vmul.f32 %v1344_v53, %v3154_v22  ;;  %v2713_v22 = vld [vmem:[%s3367_s0 + $0x70] sm:$0xff] }
0x1125   :  { %v1450_v61 = vmul.f32 %v1448_v58, %v1445_v2 }
0x118f   :  { %v1349_v54 = vpop.permute.xlu0 %1348 }
0x1190   :  { %v1351_v55 = vmul.f32 %v1349_v54, %v1344_v53 }
0x1191   :  { %v1453_v4 = vpop.permute.xlu1 %1452 }
0x1192   :  { %1353 = vrot.lane.b32.xlu0 %v1351_v55, %s2745_s11  ;;  %v1455_v56 = vmul.f32 %v1453_v4, %v1445_v2 }
0x1194   :  { %1457 = vrot.lane.b32.xlu1 %v1455_v56, %s2745_s11 }
0x1204   :  { %v1354_v59 = vpop.permute.xlu0 %1353 }
0x1205   :  { %v3208_v60 = vadd.f32 %v1354_v59, %v1346_v57 }
0x1206   :  { %v1458_v62 = vpop.permute.xlu1 %1457 }
0x1207   :  { %2665 = vtanh.f32 %v3208_v60  ;;  %v3211_v63 = vadd.f32 %v1458_v62, %v1450_v61  ;;  %v2719_v62 = vld [vmem:[%s3367_s0 + $0x88] ss:$0 sm:$0xff] }
0x1209   :  { %2667 = vtanh.f32 %v3211_v63  ;;  %v1658_v36 = vrot.slane %v3211_v63, 6 }
0x1214   :  { %v2666_v0 = vpop.eup %2665 }
0x1215   :  { %1359 = vrot.lane.b32.xlu0 %v2666_v0, %s2744_s10 }
0x1216   :  { %v2668_v1 = vpop.eup %2667 }
0x1217   :  { %1463 = vrot.lane.b32.xlu1 %v2668_v1, %s2744_s10 }
0x1287   :  { %v1360_v5 = vpop.permute.xlu0 %1359 }
0x1288   :  { %v1362_v6 = vmul.f32 %v1360_v5, %v1344_v53 }
0x1289   :  { %v1464_v9 = vpop.permute.xlu1 %1463 }
0x128a   :  { %v1472_v7 = vrot.slane %v1362_v6, 4  ;;  %v1466_v11 = vmul.f32 %v1464_v9, %v1445_v2 }
0x128c   :  { %1473 = vrot.lane.b32.xlu1 %v1472_v7, %s2744_s10  ;;  %1468 = vrot.lane.b32.xlu0 %v1466_v11, %s2745_s11  ;;  %v1573_v12 = vrot.slane %v1466_v11, 4 }
0x1290   :  { %1574 = vrot.lane.b32.xlu0 %v1573_v12, %s2745_s11 }
0x12fe   :  { %v1474_v14 = vpop.permute.xlu1 %1473  ;;  %v1469_v15 = vpop.permute.xlu0 %1468 }
0x12ff   :  { %v1476_v17 = vsel %vm41_vm0, %v1469_v15, %v1474_v14 }
0x1300   :  { %v1478_v18 = vrot.slane %v1476_v17, 4 }
0x1302   :  { %v1575_v19 = vpop.permute.xlu0 %1574  ;;  %2513 = vmatmul.mubr.msk.f32.vlgmr.msra.gmra.mxu0 %vm228_vm2, %v1478_v18  ;;  %v1786_v18 = vld [vmem:[%s3367_s0 + $0xa8] sm:$0xff] }
0x1303   :  { %2524 = vmatmul.mubr.msk.f32.vlgmr.msra.gmra.mxu1 %vm41_vm0, %v1575_v19  ;;  %2553 = vmatprep.mubr.msk.f32.mxu0 %vm2743_vm1, %v2742_v3  ;;  %v1785_v19 = vld [vmem:[%s3367_s0 + $0xa0] sm:$0xff] }
0x1304   :  { %2527 = vmatpush3.msra.mxu1 %v2711_v20  ;;  %2542 = vmatprep.mubr.msk.f32.mxu1 %vm2743_vm1, %v2742_v3  ;;  %v1784_v20 = vld [vmem:[%s3367_s0 + $0x98] sm:$0xff] }
0x1305   :  { %2528 = vmatprep.subr.mxu1 %v2742_v3  ;;  %2546 = vmatpush3.msra.mxu0 %v1786_v18 }
0x1306   :  { %2529 = vmatpush3.msra.mxu1 %v2712_v21  ;;  %2547 = vmatprep.subr.mxu0 %v2742_v3  ;;  %v1783_v21 = vld [vmem:[%s3367_s0 + $0x90] sm:$0xff] }
0x1307   :  { %2530 = vmatprep.subr.mxu1 %v2742_v3  ;;  %2548 = vmatpush3.msra.mxu0 %v1785_v19 }
0x1308   :  { %2531 = vmatpush3.msra.mxu1 %v2713_v22  ;;  %2549 = vmatprep.subr.mxu0 %v2742_v3 }
0x1309   :  { %2532 = vmatprep.subr.mxu1 %v2742_v3  ;;  %2550 = vmatpush3.msra.mxu0 %v1784_v20 }
0x130a   :  { %2533 = vmatpush3.msra.mxu1 %v2714_v23  ;;  %2551 = vmatprep.subr.mxu0 %v2742_v3 }
0x130b   :  { %2534 = vmatprep.subr.mxu1 %v2742_v3  ;;  %2552 = vmatpush3.msra.mxu0 %v1783_v21 }
0x130c   :  { %2535 = vmatpush3.msra.mxu1 %v2715_v24  ;;  %2556 = vmatprep.subr.mxu0 %v2742_v3 }
0x130d   :  { %2536 = vmatprep.subr.mxu1 %v2742_v3 }
0x130e   :  { %2537 = vmatpush3.msra.mxu1 %v2716_v25  ;;  %v1791_v25 = vld [vmem:[%s3367_s0 + $0xd0] sm:$0xff] }
0x130f   :  { %2538 = vmatprep.subr.mxu1 %v2742_v3 }
0x1310   :  { %2539 = vmatpush3.msra.mxu1 %v2717_v26 }
0x1311   :  { %2540 = vmatprep.subr.mxu1 %v2742_v3 }
0x1312   :  { %2541 = vmatpush3.msra.mxu1 %v2718_v27  ;;  %v1790_v27 = vld [vmem:[%s3367_s0 + $0xc8] sm:$0xff] }
0x13c2   :  { %v1547_v28 = vpop.f32.mrf.mxu0 }
0x13c3   :  { %v1548_v35 = vadd.f32 %v2946_v42, %v1547_v28  ;;  %v1644_v38 = vpop.f32.mrf.mxu1  ;;  %v1789_v28 = vld [vmem:[%s3367_s0 + $0xc0] sm:$0xff] }
0x13c4   :  { %v1649_v39 = vrot.slane %v1644_v38, 2  ;;  %v2514_v40 = vpop.f32.mrf.mxu0  ;;  %v2154_v38 = vld [vmem:[%s3367_s0 + $0xb0] ss:$0 sm:$0xff] }
0x13c5   :  { %2669 = vtanh.f32 %v1548_v35  ;;  %v2525_v41 = vpop.f32.mrf.mxu1  ;;  %v1551_v46 = vmul.f32 0.5, %v1548_v35  ;;  %v1788_v35 = vld [vmem:[%s3367_s0 + $0xb8] sm:$0xff] }
0x13c6   :  { %v1651_v43 = vadd.f32 %v1649_v39, %v2844_v13 }
0x13c8   :  { %2671 = vtanh.f32 %v1651_v43  ;;  %v1652_v47 = vmul.f32 0.5, %v1651_v43  ;;  %v1949_v43 = vlaneseq }
0x13c9   :  { %2673 = vtanh.f32 %v1551_v46 }
0x13ca   :  { %2675 = vtanh.f32 %v1652_v47 }
0x13d2   :  { %v2670_v44 = vpop.eup %2669 }
0x13d3   :  { %1558 = vrot.lane.b32.xlu1 %v2670_v44, %s2744_s10  ;;  %v3316_v44 = vand.u32 127, %v1949_v43 }
0x13d5   :  { %v2672_v45 = vpop.eup %2671  ;;  %vm1951_vm3 = vcmp.lt.s32.totalorder %v3316_v44, 3 }
0x13d6   :  { %1662 = vrot.lane.b32.xlu0 %v2672_v45, %s2744_s10  ;;  %v2674_v16 = vpop.eup %2673  ;;  %v2156_v45 = vld [vmem:[%s3367_s0 + $0xd8] ss:$0 sm:$0xff]  ;;  %s2724_s0 = scalar_lea.vmem %s2126_s17, 32 }
0x13d7   :  { %v2676_v42 = vpop.eup %2675  ;;  %v1553_v8 = vadd.f32 1.0, %v2674_v16  ;;  %p2726_p2 = scmp.lt.s32.totalorder %s2724_s0, %s2720_s19 }
0x13d8   :  { %v1654_v10 = vadd.f32 1.0, %v2676_v42 }
0x13d9   :  { %v1554_v29 = vmul.f32 0.5, %v1553_v8  ;;  %p2727_p3 = por %p2726_p2, %p2725_p1 }
0x13da   :  { %v1655_v32 = vmul.f32 0.5, %v1654_v10 }
0x13db   :  { %v1556_v34 = vmul.f32 %v1554_v29, %v3208_v60  ;;  %p2728_p4 = pnand %p2727_p3, %p2721_p0 }
0x13dc   :  { %v1660_v49 = vmul.f32 %v1658_v36, %v1655_v32 }
0x1445   :  { %v1559_v30 = vpop.permute.xlu1 %1558 }
0x1446   :  { %v1561_v31 = vmul.f32 %v1559_v30, %v1554_v29 }
0x1448   :  { %v1663_v13 = vpop.permute.xlu0 %1662  ;;  %1563 = vrot.lane.b32.xlu1 %v1561_v31, %s2745_s11 }
0x1449   :  { %v1665_v33 = vmul.f32 %v1663_v13, %v1655_v32  ;;  %v2746_v13 = vmov 0  }
0x144a   :  { %2587 = vset.pattern.permute.xlu1 %v2746_v13  ;;  %2586 = vset.pattern.permute.xlu0 %v2746_v13 }
0x144b   :  { %1667 = vrot.lane.b32.xlu0 %v1665_v33, %s2745_s11 }
0x14ba   :  { %v1564_v37 = vpop.permute.xlu1 %1563 }
0x14bb   :  { %v1566_v48 = vadd.f32 %v1564_v37, %v1556_v34  ;;  %v1969_v34 = vshrl.u32 %v1949_v43, 7 }
0x14bd   :  { %2677 = vtanh.f32 %v1566_v48  ;;  %v1668_v50 = vpop.permute.xlu0 %1667  ;;  %v1976_v36 = vsub.s32 1, %v1969_v34  ;;  %v1970_v37 = vsub.s32 0, %v1969_v34 }
0x14be   :  { %v1670_v51 = vadd.f32 %v1668_v50, %v1660_v49 }
0x14c0   :  { %2679 = vtanh.f32 %v1670_v51 }
0x14ca   :  { %v2678_v52 = vpop.eup %2677 }
0x14cb   :  { %1569 = vrot.lane.b32.xlu1 %v2678_v52, %s2744_s10  ;;  %v2747_v52 = vmov 1  }
0x14cd   :  { %v2680_v53 = vpop.eup %2679 }
0x14ce   :  { %1673 = vrot.lane.b32.xlu0 %v2680_v53, %s2744_s10  ;;  %v2162_v53 = vld [vmem:[%s3369_s2 + $0x30] sm:$0xff] }
0x153d   :  { %v1570_v54 = vpop.permute.xlu1 %1569 }
0x153e   :  { %v1572_v55 = vmul.f32 %v1570_v54, %v1554_v29  ;;  %v2748_v54 = vmov 2  }
0x1540   :  { %v1682_v2 = vrot.slane %v1572_v55, 2  ;;  %v1674_v4 = vpop.permute.xlu0 %1673  ;;  %v2567_v55 = vtrunc.f32 %v2162_v53 }
0x1541   :  { %v1676_v56 = vmul.f32 %v1674_v4, %v1655_v32 }
0x1542   :  { %1683 = vrot.lane.b32.xlu0 %v1682_v2, %s2744_s10  ;;  %v2163_v2 = vld [vmem:[%s3369_s2 + $0x38] sm:$0xff]  ;;  %v3328_v4 = vcvt.f32.s32 %v2567_v55 }
0x1543   :  { %1678 = vrot.lane.b32.xlu1 %v1676_v56, %s2745_s11  ;;  %v2569_v56 = vtrunc.f32 %v2163_v2 }
0x1544   :  { %vm2075_vm7 = vcmp.ne.s32.totalorder %v3328_v4, 1 }
0x15b4   :  { %v1684_v57 = vpop.permute.xlu0 %1683 }
0x15b5   :  { %v1679_v58 = vpop.permute.xlu1 %1678 }
0x15b6   :  { %v1686_v59 = vsel %vm41_vm0, %v1679_v58, %v1684_v57  ;;  %v3331_v57 = vcvt.f32.s32 %v2569_v56  ;;  %v1980_v58 = vld [vmem:[%s3369_s2] sm:$0xff] }
0x15b7   :  { %v1688_v60 = vrot.slane %v1686_v59, 6  ;;  %v2158_v59 = vld [vmem:[%s3369_s2 + $0x10] sm:$0xff] }
0x15b8   :  { %vm2076_vm9 = vcmp.ne.s32.totalorder %v3331_v57, 1 }
0x15b9   :  { %2543 = vmatmul.mubr.msk.f32.vlgmr.msra.gmra.mxu1 %vm228_vm2, %v1688_v60  ;;  %v1981_v60 = vld [vmem:[%s3369_s2 + $0x8] sm:$0xff]  ;;  %v2165_v53 = vsel %vm2076_vm9, 1.0, %v2742_v3 }
0x15ba   :  { %v2097_v55 = vsel %vm2079_vm8, %v2165_v53, 0.0 }
0x1679   :  { %v1757_v61 = vpop.f32.mrf.mxu1 }
0x167a   :  { %v1758_v63 = vadd.f32 %v2719_v62, %v1757_v61  ;;  %v2159_v61 = vld [vmem:[%s3369_s2 + $0x18] sm:$0xff]  ;;  %v1985_v62 = vmax.f32 %v1980_v58, %v2158_v59 }
0x167b   :  { %v2544_v0 = vpop.f32.mrf.mxu1 }
0x167c   :  { %2681 = vtanh.f32 %v1758_v63  ;;  %v1761_v5 = vmul.f32 0.5, %v1758_v63  ;;  %v2160_v63 = vld [vmem:[%s3369_s2 + $0x20] sm:$0xff]  ;;  %v1986_v0 = vmax.f32 %v1981_v60, %v2159_v61 }
0x167e   :  { %2683 = vtanh.f32 %v1761_v5  ;;  %v1990_v5 = vmax.f32 %v1985_v62, %v2160_v63 }
0x1689   :  { %v2682_v1 = vpop.eup %2681 }
0x168a   :  { %1768 = vrot.lane.b32.xlu1 %v2682_v1, %s2744_s10  ;;  %v2161_v1 = vld [vmem:[%s3369_s2 + $0x28] sm:$0xff] }
0x168b   :  { %v2684_v6 = vpop.eup %2683 }
0x168c   :  { %v1763_v7 = vadd.f32 1.0, %v2684_v6  ;;  %v2012_v6 = vsub.f32 %v2158_v59, %v1990_v5 }
0x168e   :  { %v1764_v9 = vmul.f32 0.5, %v1763_v7  ;;  %v1991_v7 = vmax.f32 %v1986_v0, %v2161_v1 }
0x1690   :  { %v1766_v14 = vmul.f32 %v1764_v9, %v1566_v48  ;;  %v2031_v20 = vsub.f32 %v2161_v1, %v1991_v7 }
0x16fc   :  { %v1769_v11 = vpop.permute.xlu1 %1768 }
0x16fd   :  { %v1771_v12 = vmul.f32 %v1769_v11, %v1764_v9  ;;  %v2013_v11 = vsub.f32 %v2159_v61, %v1991_v7 }
0x16ff   :  { %1773 = vrot.lane.b32.xlu0 %v1771_v12, %s2745_s11  ;;  %v2014_v12 = vmul.f32 1.442695, %v2012_v6  ;;  %v2016_v18 = vmul.f32 1.442695, %v2013_v11 }
0x1771   :  { %v1774_v15 = vpop.permute.xlu0 %1773 }
0x1772   :  { %v1776_v17 = vadd.f32 %v1774_v15, %v1766_v14  ;;  %v2030_v14 = vsub.f32 %v2160_v63, %v1990_v5  ;;  %v1993_v15 = vsub.f32 %v1981_v60, %v1991_v7 }
0x1774   :  { %2685 = vtanh.f32 %v1776_v17  ;;  %v2032_v19 = vmul.f32 1.442695, %v2030_v14  ;;  %v1996_v21 = vmul.f32 1.442695, %v1993_v15 }
0x1781   :  { %v2686_v22 = vpop.eup %2685 }
0x1782   :  { %1779 = vrot.lane.b32.xlu1 %v2686_v22, %s2744_s10  ;;  %v2034_v22 = vmul.f32 1.442695, %v2031_v20  ;;  %s2749_s10 = smov 1.0  }
0x17f4   :  { %v1780_v23 = vpop.permute.xlu1 %1779 }
0x17f5   :  { %v1782_v24 = vmul.f32 %v1780_v23, %v1764_v9  ;;  %v1992_v9 = vsub.f32 %v1980_v58, %v1990_v5 }
0x17f7   :  { %1798 = vrot.lane.b32.xlu0 %v1782_v24, %s2745_s11  ;;  %v1994_v17 = vmul.f32 1.442695, %v1992_v9 }
0x1869   :  { %v1799_v26 = vpop.permute.xlu0 %1798 }
0x186a   :  { %2554 = vmatmul.mubr.msk.f32.vlgmr.msra.gmra.mxu0 %vm41_vm0, %v1799_v26 }
0x186b   :  { %2557 = vmatpush3.msra.mxu0 %v1791_v25  ;;  %2564 = vmatprep.mubr.msk.f32.mxu0 %vm2743_vm1, %v2742_v3 }
0x186c   :  { %2558 = vmatprep.subr.mxu0 %v2742_v3 }
0x186d   :  { %2559 = vmatpush3.msra.mxu0 %v1790_v27 }
0x186e   :  { %2560 = vmatprep.subr.mxu0 %v2742_v3 }
0x186f   :  { %2561 = vmatpush3.msra.mxu0 %v1789_v28 }
0x1870   :  { %2562 = vmatprep.subr.mxu0 %v2742_v3 }
0x1871   :  { %2563 = vmatpush3.msra.mxu0 %v1788_v35 }
0x192a   :  { %v1868_v39 = vpop.f32.mrf.mxu0 }
0x192b   :  { %v1869_v40 = vadd.f32 %v2154_v38, %v1868_v39 }
0x192c   :  { %v2555_v41 = vpop.f32.mrf.mxu0 }
0x192d   :  { %2565 = vmatmul.mubr.msk.f32.vlgmr.msra.gmra.mxu0 %vm41_vm0, %v1869_v40 }
0x19ed   :  { %v1945_v46 = vpop.f32.mrf.mxu0 }
0x19ee   :  { %v1946_v47 = vadd.f32 %v2156_v45, %v1945_v46 }
0x19ef   :  { %v2566_v16 = vpop.f32.mrf.mxu0 }
0x19f0   :  { %v1952_v42 = vsel %vm1951_vm3, %v1946_v47, -inf }
0x19f1   :  { %v1954_v8 = vsel %vm1953_vm4, %v1952_v42, -inf }
0x19f2   :  { %1955 = vmax.xlane.f32.xlu1 %v1954_v8 }
0x1a7b   :  { %v1956_v10 = vpop.xlane.xlu1 %1955 }
0x1a7c   :  { %v1957_v29 = vsub.f32 %v1952_v42, %v1956_v10 }
0x1a7e   :  { %v1958_v30 = vmul.f32 1.442695, %v1957_v29 }
0x1a80   :  { %2687 = vpow2.f32 %v1958_v30 }
0x1a8d   :  { %v2688_v31 = vpop.eup %2687 }
0x1a8e   :  { %v1960_v32 = vsel %vm1953_vm4, %v2688_v31, 0.0 }
0x1a8f   :  { %1961 = vadd.xlane.f32.xlu0 %v1960_v32 }
0x1b18   :  { %v1962_v33 = vpop.xlane.xlu0 %1961 }
0x1b19   :  { %2689 = vrcp.f32 %v1962_v33 }
0x1b1a   :  { %2691 = vpow2.f32 %v2014_v12 }
0x1b1b   :  { %2693 = vpow2.f32 %v1994_v17 }
0x1b1c   :  { %2695 = vpow2.f32 %v2016_v18 }
0x1b1d   :  { %2697 = vpow2.f32 %v2032_v19 }
0x1b1e   :  { %2699 = vpow2.f32 %v1996_v21 }
0x1b1f   :  { %2701 = vpow2.f32 %v2034_v22 }
0x1b26   :  { %v2690_v48 = vpop.eup %2689 }
0x1b27   :  { %v1964_v49 = vmul.f32 %v2690_v48, %v2688_v31  ;;  %v2692_v25 = vpop.eup %2691 }
0x1b28   :  { %v2694_v27 = vpop.eup %2693 }
0x1b29   :  { %v1977_v50 = vrot.slane %v1964_v49, %v1976_v36  ;;  %v1971_v51 = vrot.slane %v1964_v49, %v1970_v37  ;;  %v2696_v35 = vpop.eup %2695 }
0x1b2a   :  { %v2698_v39 = vpop.eup %2697 }
0x1b2b   :  { %2005 = vperm.xlu1 %2587, %v1977_v50   ;;  %2000 = vperm.xlu0 %2586, %v1971_v51   ;;  %v2700_v41 = vpop.eup %2699 }
0x1b2c   :  { %v2702_v16 = vpop.eup %2701 }
0x1b2f   :  { %2588 = vset.pattern.permute.xlu1 %v2747_v52  ;;  %v2164_v52 = vsel %vm2075_vm7, 1.0, %v2742_v3 }
0x1b30   :  { %2019 = vperm.xlu1 %2588, %v1971_v51  }
0x1b34   :  { %2023 = vperm.xlu1 %2588, %v1977_v50  }
0x1b38   :  { %2589 = vset.pattern.permute.xlu1 %v2748_v54  ;;  %v2096_v54 = vsel %vm2079_vm8, %v2164_v52, 0.0 }
0x1b39   :  { %2037 = vperm.xlu1 %2589, %v1971_v51   ;;  %v2098_v2 = vadd.f32 %v2097_v55, %v2096_v54 }
0x1b3d   :  { %2041 = vperm.xlu1 %2589, %v1977_v50  }
0x1b41   :  { %2590 = vset.pattern.permute.xlu1 %v2746_v13 }
0x1b42   :  { %2062 = vperm.xlu1 %2590, %v3328_v4  }
0x1b46   :  { %2065 = vperm.xlu1 %2590, %v3331_v57  }
0x1ba6   :  { %v2006_v23 = vpop.permute.xlu1 %2005  ;;  %v2001_v28 = vpop.permute.xlu0 %2000 }
0x1ba7   :  { %v2008_v40 = vmul.f32 %v2694_v27, %v2001_v28  ;;  %v2009_v42 = vmul.f32 %v2700_v41, %v2006_v23 }
0x1bab   :  { %v2020_v24 = vpop.permute.xlu1 %2019 }
0x1bac   :  { %v2026_v38 = vmul.f32 %v2692_v25, %v2020_v24 }
0x1bae   :  { %v2028_v45 = vadd.f32 %v2026_v38, %v2008_v40 }
0x1baf   :  { %v2024_v26 = vpop.permute.xlu1 %2023 }
0x1bb0   :  { %v2027_v46 = vmul.f32 %v2696_v35, %v2024_v26 }
0x1bb2   :  { %v2029_v29 = vadd.f32 %v2027_v46, %v2009_v42 }
0x1bb4   :  { %v2038_v43 = vpop.permute.xlu1 %2037 }
0x1bb5   :  { %v2044_v47 = vmul.f32 %v2698_v39, %v2038_v43 }
0x1bb7   :  { %v2046_v8 = vadd.f32 %v2044_v47, %v2028_v45 }
0x1bb8   :  { %v2042_v10 = vpop.permute.xlu1 %2041 }
0x1bb9   :  { %2703 = vlog2.f32 %v2046_v8  ;;  %v2045_v30 = vmul.f32 %v2702_v16, %v2042_v10 }
0x1bbb   :  { %v2047_v31 = vadd.f32 %v2045_v30, %v2029_v29 }
0x1bbd   :  { %2705 = vlog2.f32 %v2047_v31  ;;  %v2063_v32 = vpop.permute.xlu1 %2062 }
0x1bbe   :  { %vm2067_vm5 = vcmp.eq.s32.totalorder %v3316_v44, %v2063_v32 }
0x1bc1   :  { %v2066_v37 = vpop.permute.xlu1 %2065 }
0x1bc2   :  { %vm2068_vm6 = vcmp.eq.s32.totalorder %v3316_v44, %v2066_v37 }
0x1bc6   :  { %v2704_v13 = vpop.eup %2703 }
0x1bc7   :  { %v2049_v33 = vmul.f32 0.6931472, %v2704_v13 }
0x1bc9   :  { %v2052_v34 = vadd.f32 %v2049_v33, %v1990_v5 }
0x1bca   :  { %v2706_v36 = vpop.eup %2705 }
0x1bcb   :  { %v2069_v48 = vsel %vm2067_vm5, %v2052_v34, 0.0  ;;  %2054 = vst [vmem:[%s3370_s3] sm:$0xff] %v2052_v34  ;;  %v2051_v49 = vmul.f32 0.6931472, %v2706_v36 }
0x1bcc   :  { %2071 = vadd.xlane.f32.xlu1 %v2069_v48 }
0x1bcd   :  { %v2053_v50 = vadd.f32 %v2051_v49, %v1991_v7 }
0x1bcf   :  { %2055 = vst [vmem:[%s3370_s3 + $0x8] sm:$0xff] %v2053_v50  ;;  %v2070_v51 = vsel %vm2068_vm6, %v2053_v50, 0.0 }
0x1bd0   :  { %2073 = vadd.xlane.f32.xlu0 %v2070_v51  ;;  %2099 = vadd.xlane.f32.xlu1 %v2098_v2 }
0x1c55   :  { %v2072_v44 = vpop.xlane.xlu1 %2071 }
0x1c56   :  { %v2077_v56 = vsel %vm2075_vm7, %v2072_v44, 0.0 }
0x1c57   :  { %v2080_v60 = vsel %vm2079_vm8, %v2077_v56, 0.0 }
0x1c59   :  { %v2074_v58 = vpop.xlane.xlu0 %2073  ;;  %v2100_v4 = vpop.xlane.xlu1 %2099 }
0x1c5a   :  { %v2078_v59 = vsel %vm2076_vm9, %v2074_v58, 0.0  ;;  %v2101_v63 = vrot.slane %v2100_v4, 4 }
0x1c5b   :  { %v2081_v61 = vsel %vm2079_vm8, %v2078_v59, 0.0 }
0x1c5c   :  { %v2082_v62 = vadd.f32 %v2081_v61, %v2080_v60  ;;  %v2102_v0 = vadd.f32 %v2101_v63, %v2100_v4 }
0x1c5e   :  { %2083 = vadd.xlane.f32.xlu0 %v2082_v62  ;;  %v2103_v1 = vrot.slane %v2102_v0, 2 }
0x1c60   :  { %v2104_v3 = vadd.f32 %v2103_v1, %v2102_v0 }
0x1c62   :  { %v2105_v11 = vrot.slane %v2104_v3, 1 }
0x1c64   :  { %v2106_v15 = vadd.f32 %v2105_v11, %v2104_v3 }
0x1ce7   :  { %v2084_v5 = vpop.xlane.xlu0 %2083 }
0x1ce8   :  { %v2085_v57 = vrot.slane %v2084_v5, 4 }
0x1cea   :  { %v2086_v6 = vadd.f32 %v2085_v57, %v2084_v5 }
0x1cec   :  { %v2087_v7 = vrot.slane %v2086_v6, 2 }
0x1cee   :  { %v2088_v9 = vadd.f32 %v2087_v7, %v2086_v6 }
0x1cf0   :  { %v2089_v12 = vrot.slane %v2088_v9, 1 }
0x1cf2   :  { %v2090_v14 = vadd.f32 %v2089_v12, %v2088_v9 }
0x1cf4   :  { %2571 = vpush %v2090_v14 }
0x1cf5   :  { %2573 = vpush %v2106_v15 }
0x1d25   :  { %s2572_s3 = spop %2571 }
0x1d26   :  { %s2574_s13 = spop %2573 }
0x1d27   :  { %s2108_s11 = smax.f32 %s2749_s10, %s2574_s13 }
0x1d28   :  { %v2109_v17 = vstv %s2108_s11 }
0x1d29   :  { %2707 = vrcp.f32 %v2109_v17 }
0x1d36   :  { %v2708_v18 = vpop.eup %2707 }
0x1d37   :  { %2575 = vpush %v2708_v18 }
0x1d68   :  { %s2576_s14 = spop %2575 }
0x1d69   :  { %s2112_s15 = smul.f32 %s2576_s14, %s2572_s3 }
0x1d6b   :  { %s2113_s18 = ssub.f32 0.0, %s2112_s15 }
0x1d6d   :  { %v2114_v19 = vstv %s2113_s18 }
0x1d6e   :  { %2116 = vst.msk [vmem:[#allocation2] sm:$0x1] %vm2115_vm10, %v2114_v19 }
0x1d6f   :  { %2731 = shalt.err (!%p2728_p4)
}
0x1d70   :  { %2128 = dma.vmem_to_hbm [thread:$0]  %s2126_s17, 16, %s3371_s4, [#allocation3]  }
0x1d71   :  { %2740 = dma.done.wait [#allocation3], 16  }
0x1d72   :  { %2741 = vsyncadd [#allocation3], 4294967280 }
0x1d73   :  { %2134 = vsyncpa [#allocation3], 1 }

</bundles_post_ra>
